<compile_context>
chip_gen: v7x
topology: tpu7x:2x2x1
jax: 0.10.0
libtpu: 0.0.40
codegen_flags: <defaults>
</compile_context>

<pallas_src>
import functools

import jax
import jax.numpy as jnp
from jax.experimental import pallas as pl
from jax.experimental.pallas import tpu as pltpu


def _gcln_dnf3_kernel(x_ref, w_and_ref, w_or_ref, out_ref, *, k, o_size):
    # x_ref:     (n_vars, TB)   literals on sublanes, batch on lanes
    # w_and_ref: (O*K, 2*n_vars) transposed layer_and_weights (K on sublanes)
    # w_or_ref:  (O*K, 1)        layer_or_weights as-is (K on sublanes)
    # out_ref:   (O, TB)         lane-dense output slab
    x = x_ref[...]                                   # (n, TB) f32
    # clamp_(0,1) from DNF_Netowrk3.forward; tiny weights, so re-clipping per
    # grid step is negligible (could be hoisted into a pl.when(pid==0) scratch
    # init if K*O ever grows large).
    w_and_t = jnp.clip(w_and_ref[...], 0.0, 1.0)     # (O*K, 2n)
    w_or = jnp.clip(w_or_ref[...], 0.0, 1.0)         # (O*K, 1)

    n, tb = x.shape

    rows = []
    for o in range(o_size):
        wa = w_and_t[o * k:(o + 1) * k, :]           # (K, 2n)
        # AND (product t-norm) over literals: running product on a (K, TB) vreg
        # slab.  Static unroll: n_vars is small here.
        # TODO(synk): switch to lax.fori_loop(..., unroll=4) if n_vars grows.
        acc = jnp.ones((k, tb), dtype=jnp.float32)
        for j in range(n):
            xj = x[j:j + 1, :]                       # (1, TB), broadcast over K
            wp = wa[:, j:j + 1]                      # (K, 1), broadcast over TB
            wn = wa[:, n + j:n + j + 1]              # (K, 1)
            # positive literal:  w*x + (1-w)
            # negated  literal:  w*(1-x) + (1-w) == 1 - w*x   (concat fused)
            acc = acc * (wp * xj + (1.0 - wp)) * (1.0 - wn * xj)

        # OR over the K terms: 1 - prod_k(1 - W_or * acc)
        wo = w_or[o * k:(o + 1) * k, :]              # (K, 1)
        t = 1.0 - wo * acc                           # (K, TB)
        # log2(K)-depth multiply tree over the sublane (K) axis.
        while t.shape[0] > 1:
            m = t.shape[0]
            if m % 2 == 0:
                half = m // 2
                t = t[:half, :] * t[half:, :]
            else:
                t = jnp.prod(t, axis=0, keepdims=True)
        rows.append(1.0 - t)                         # (1, TB)

    out_ref[...] = jnp.concatenate(rows, axis=0)     # (O, TB)


def gcln_dnf_arch3_forward(x, layer_and_weights, layer_or_weights, *, K,
                           tile_b=256):
    """x: (B, n_vars); layer_and_weights: (2*n_vars, K*O); layer_or_weights:
    (K*O, 1).  Returns (B, O) like GCLN_DNF_Arch3.forward."""
    b, n = x.shape
    two_n, hk = layer_and_weights.shape
    assert two_n == 2 * n, "layer_and_weights rows must equal 2 * n_vars"
    assert layer_or_weights.shape == (hk, 1)
    assert hk % K == 0
    o_size = hk // K
    assert tile_b % 128 == 0, "batch tile must be lane-dense (multiple of 128)"
    assert b % tile_b == 0, "batch must be divisible by the batch tile"

    # Layout plumbing (tiny one-time XLA transposes): batch on lanes, K on
    # sublanes inside the kernel.
    x_t = x.T.astype(jnp.float32)                        # (n, B)
    w_and_t = layer_and_weights.T.astype(jnp.float32)    # (O*K, 2n)
    w_or = layer_or_weights.astype(jnp.float32)          # (O*K, 1)

    grid = (b // tile_b,)
    kernel = functools.partial(_gcln_dnf3_kernel, k=K, o_size=o_size)
    out_t = pl.pallas_call(
        kernel,
        out_shape=jax.ShapeDtypeStruct((o_size, b), jnp.float32),
        grid_spec=pltpu.PrefetchScalarGridSpec(
            num_scalar_prefetch=0,
            grid=grid,
            in_specs=[
                pl.BlockSpec((n, tile_b), lambda i: (0, i)),       # x tile
                pl.BlockSpec((hk, two_n), lambda i: (0, 0)),       # W_and, resident
                pl.BlockSpec((hk, 1), lambda i: (0, 0)),           # W_or, resident
            ],
            out_specs=pl.BlockSpec((o_size, tile_b), lambda i: (0, i)),
        ),
        compiler_params=pltpu.CompilerParams(
            dimension_semantics=("parallel",)),
    )(x_t, w_and_t, w_or)
    return out_t.T                                       # (B, O)


if __name__ == "__main__":
    # Small shapes consistent with the module:
    #   n_vars = 8 -> input_size (literal count) = 16, K = 32 terms per output,
    #   output_size = 2, batch B = 256 (two lane-dense tiles of 128 -> both
    #   TensorCores get work on v7x).
    B, n_vars, K, O = 256, 8, 32, 2

    key = jax.random.PRNGKey(0)
    kx, ka, ko = jax.random.split(key, 3)
    x = jax.random.uniform(kx, (B, n_vars), dtype=jnp.float32)
    # Parameters: uniform(0, 1) exactly like torch.Tensor(...).uniform_(0, 1)
    w_and = jax.random.uniform(ka, (2 * n_vars, K * O), dtype=jnp.float32)
    w_or = jax.random.uniform(ko, (K * O, 1), dtype=jnp.float32)

    out = gcln_dnf_arch3_forward(x, w_and, w_or, K=K, tile_b=128)
    out = jax.block_until_ready(out)
    assert out.shape == (B, O)

    # Pure-JAX reference mirroring the PyTorch forward, for a sanity check.
    w_and_c = jnp.clip(w_and, 0.0, 1.0)
    w_or_c = jnp.clip(w_or, 0.0, 1.0)
    inputs = jnp.concatenate([x, 1.0 - x], axis=1)[:, :, None]       # (B, 2n, 1)
    refs = []
    for i in range(O):
        wa = w_and_c[:, i * K:(i + 1) * K]                            # (2n, K)
        gated = wa[None, :, :] * inputs + (1.0 - wa)[None, :, :]      # (B, 2n, K)
        anded = jnp.prod(gated, axis=1)                               # (B, K)
        wo = w_or_c[i * K:(i + 1) * K, :]                             # (K, 1)
        g2 = wo[None, :, :] * anded[:, :, None]                       # (B, K, 1)
        refs.append(1.0 - jnp.prod(1.0 - g2, axis=1)[:, 0])           # (B,)
    ref = jnp.stack(refs, axis=1)                                     # (B, O)
    assert jnp.allclose(out, ref, atol=1e-5, rtol=1e-5), "mismatch vs reference"

    print("KERNEL_OK")
</pallas_src>

<mosaic_0001>
module attributes {stable_mosaic.version = 11 : i64} {
  func.func @_gcln_dnf3_kernel(%arg0: i32, %arg1: memref<8x128xf32, #tpu.memory_space<vmem>>, %arg2: memref<64x16xf32, #tpu.memory_space<vmem>>, %arg3: memref<64x1xf32, #tpu.memory_space<vmem>>, %arg4: memref<2x128xf32, #tpu.memory_space<vmem>>) attributes {dimension_semantics = [#tpu.dimension_semantics<parallel>], iteration_bounds = array<i64: 2>, scalar_prefetch = 0 : i64, scratch_operands = 0 : i64, tpu.core_type = #tpu.core_type<tc>, window_params = [{transform_indices = @transform_0, window_bounds = array<i64: 8, 128>}, {pipeline_mode = #tpu.pipeline_mode<synchronous>, transform_indices = @transform_1, window_bounds = array<i64: 64, 16>}, {pipeline_mode = #tpu.pipeline_mode<synchronous>, transform_indices = @transform_2, window_bounds = array<i64: 64, 1>}, {transform_indices = @transform_3, window_bounds = array<i64: 2, 128>}]} {
    %c0 = arith.constant 0 : index
    %c0_0 = arith.constant 0 : index
    %0 = vector.load %arg1[%c0, %c0_0] : memref<8x128xf32, #tpu.memory_space<vmem>>, vector<8x128xf32>
    %c0_1 = arith.constant 0 : index
    %c0_2 = arith.constant 0 : index
    %1 = vector.load %arg2[%c0_1, %c0_2] : memref<64x16xf32, #tpu.memory_space<vmem>>, vector<64x16xf32>
    %cst = arith.constant 0.000000e+00 : f32
    %cst_3 = arith.constant 1.000000e+00 : f32
    %2 = vector.broadcast %cst : f32 to vector<64x16xf32>
    %3 = arith.maximumf %2, %1 : vector<64x16xf32>
    %4 = vector.broadcast %cst_3 : f32 to vector<64x16xf32>
    %5 = arith.minimumf %4, %3 : vector<64x16xf32>
    %c0_4 = arith.constant 0 : index
    %c0_5 = arith.constant 0 : index
    %6 = vector.load %arg3[%c0_4, %c0_5] : memref<64x1xf32, #tpu.memory_space<vmem>>, vector<64x1xf32>
    %cst_6 = arith.constant 0.000000e+00 : f32
    %cst_7 = arith.constant 1.000000e+00 : f32
    %7 = vector.broadcast %cst_6 : f32 to vector<64x1xf32>
    %8 = arith.maximumf %7, %6 : vector<64x1xf32>
    %9 = vector.broadcast %cst_7 : f32 to vector<64x1xf32>
    %10 = arith.minimumf %9, %8 : vector<64x1xf32>
    %11 = vector.extract_strided_slice %5 {offsets = [0, 0], sizes = [32, 16], strides = [1, 1]} : vector<64x16xf32> to vector<32x16xf32>
    %cst_8 = arith.constant 1.000000e+00 : f32
    %12 = vector.broadcast %cst_8 : f32 to vector<32x128xf32>
    %13 = vector.extract_strided_slice %0 {offsets = [0, 0], sizes = [1, 128], strides = [1, 1]} : vector<8x128xf32> to vector<1x128xf32>
    %14 = vector.extract_strided_slice %11 {offsets = [0, 0], sizes = [32, 1], strides = [1, 1]} : vector<32x16xf32> to vector<32x1xf32>
    %15 = vector.extract_strided_slice %11 {offsets = [0, 8], sizes = [32, 1], strides = [1, 1]} : vector<32x16xf32> to vector<32x1xf32>
    %16 = vector.broadcast %14 : vector<32x1xf32> to vector<32x128xf32>
    %17 = vector.broadcast %13 : vector<1x128xf32> to vector<32x128xf32>
    %18 = arith.mulf %16, %17 : vector<32x128xf32>
    %cst_9 = arith.constant 1.000000e+00 : f32
    %19 = vector.broadcast %cst_9 : f32 to vector<32x1xf32>
    %20 = arith.subf %19, %14 : vector<32x1xf32>
    %21 = vector.broadcast %20 : vector<32x1xf32> to vector<32x128xf32>
    %22 = arith.addf %18, %21 : vector<32x128xf32>
    %23 = arith.mulf %12, %22 : vector<32x128xf32>
    %24 = vector.broadcast %15 : vector<32x1xf32> to vector<32x128xf32>
    %25 = vector.broadcast %13 : vector<1x128xf32> to vector<32x128xf32>
    %26 = arith.mulf %24, %25 : vector<32x128xf32>
    %cst_10 = arith.constant 1.000000e+00 : f32
    %27 = vector.broadcast %cst_10 : f32 to vector<32x128xf32>
    %28 = arith.subf %27, %26 : vector<32x128xf32>
    %29 = arith.mulf %23, %28 : vector<32x128xf32>
    %30 = vector.extract_strided_slice %0 {offsets = [1, 0], sizes = [1, 128], strides = [1, 1]} : vector<8x128xf32> to vector<1x128xf32>
    %31 = vector.extract_strided_slice %11 {offsets = [0, 1], sizes = [32, 1], strides = [1, 1]} : vector<32x16xf32> to vector<32x1xf32>
    %32 = vector.extract_strided_slice %11 {offsets = [0, 9], sizes = [32, 1], strides = [1, 1]} : vector<32x16xf32> to vector<32x1xf32>
    %33 = vector.broadcast %31 : vector<32x1xf32> to vector<32x128xf32>
    %34 = vector.broadcast %30 : vector<1x128xf32> to vector<32x128xf32>
    %35 = arith.mulf %33, %34 : vector<32x128xf32>
    %cst_11 = arith.constant 1.000000e+00 : f32
    %36 = vector.broadcast %cst_11 : f32 to vector<32x1xf32>
    %37 = arith.subf %36, %31 : vector<32x1xf32>
    %38 = vector.broadcast %37 : vector<32x1xf32> to vector<32x128xf32>
    %39 = arith.addf %35, %38 : vector<32x128xf32>
    %40 = arith.mulf %29, %39 : vector<32x128xf32>
    %41 = vector.broadcast %32 : vector<32x1xf32> to vector<32x128xf32>
    %42 = vector.broadcast %30 : vector<1x128xf32> to vector<32x128xf32>
    %43 = arith.mulf %41, %42 : vector<32x128xf32>
    %cst_12 = arith.constant 1.000000e+00 : f32
    %44 = vector.broadcast %cst_12 : f32 to vector<32x128xf32>
    %45 = arith.subf %44, %43 : vector<32x128xf32>
    %46 = arith.mulf %40, %45 : vector<32x128xf32>
    %47 = vector.extract_strided_slice %0 {offsets = [2, 0], sizes = [1, 128], strides = [1, 1]} : vector<8x128xf32> to vector<1x128xf32>
    %48 = vector.extract_strided_slice %11 {offsets = [0, 2], sizes = [32, 1], strides = [1, 1]} : vector<32x16xf32> to vector<32x1xf32>
    %49 = vector.extract_strided_slice %11 {offsets = [0, 10], sizes = [32, 1], strides = [1, 1]} : vector<32x16xf32> to vector<32x1xf32>
    %50 = vector.broadcast %48 : vector<32x1xf32> to vector<32x128xf32>
    %51 = vector.broadcast %47 : vector<1x128xf32> to vector<32x128xf32>
    %52 = arith.mulf %50, %51 : vector<32x128xf32>
    %cst_13 = arith.constant 1.000000e+00 : f32
    %53 = vector.broadcast %cst_13 : f32 to vector<32x1xf32>
    %54 = arith.subf %53, %48 : vector<32x1xf32>
    %55 = vector.broadcast %54 : vector<32x1xf32> to vector<32x128xf32>
    %56 = arith.addf %52, %55 : vector<32x128xf32>
    %57 = arith.mulf %46, %56 : vector<32x128xf32>
    %58 = vector.broadcast %49 : vector<32x1xf32> to vector<32x128xf32>
    %59 = vector.broadcast %47 : vector<1x128xf32> to vector<32x128xf32>
    %60 = arith.mulf %58, %59 : vector<32x128xf32>
    %cst_14 = arith.constant 1.000000e+00 : f32
    %61 = vector.broadcast %cst_14 : f32 to vector<32x128xf32>
    %62 = arith.subf %61, %60 : vector<32x128xf32>
    %63 = arith.mulf %57, %62 : vector<32x128xf32>
    %64 = vector.extract_strided_slice %0 {offsets = [3, 0], sizes = [1, 128], strides = [1, 1]} : vector<8x128xf32> to vector<1x128xf32>
    %65 = vector.extract_strided_slice %11 {offsets = [0, 3], sizes = [32, 1], strides = [1, 1]} : vector<32x16xf32> to vector<32x1xf32>
    %66 = vector.extract_strided_slice %11 {offsets = [0, 11], sizes = [32, 1], strides = [1, 1]} : vector<32x16xf32> to vector<32x1xf32>
    %67 = vector.broadcast %65 : vector<32x1xf32> to vector<32x128xf32>
    %68 = vector.broadcast %64 : vector<1x128xf32> to vector<32x128xf32>
    %69 = arith.mulf %67, %68 : vector<32x128xf32>
    %cst_15 = arith.constant 1.000000e+00 : f32
    %70 = vector.broadcast %cst_15 : f32 to vector<32x1xf32>
    %71 = arith.subf %70, %65 : vector<32x1xf32>
    %72 = vector.broadcast %71 : vector<32x1xf32> to vector<32x128xf32>
    %73 = arith.addf %69, %72 : vector<32x128xf32>
    %74 = arith.mulf %63, %73 : vector<32x128xf32>
    %75 = vector.broadcast %66 : vector<32x1xf32> to vector<32x128xf32>
    %76 = vector.broadcast %64 : vector<1x128xf32> to vector<32x128xf32>
    %77 = arith.mulf %75, %76 : vector<32x128xf32>
    %cst_16 = arith.constant 1.000000e+00 : f32
    %78 = vector.broadcast %cst_16 : f32 to vector<32x128xf32>
    %79 = arith.subf %78, %77 : vector<32x128xf32>
    %80 = arith.mulf %74, %79 : vector<32x128xf32>
    %81 = vector.extract_strided_slice %0 {offsets = [4, 0], sizes = [1, 128], strides = [1, 1]} : vector<8x128xf32> to vector<1x128xf32>
    %82 = vector.extract_strided_slice %11 {offsets = [0, 4], sizes = [32, 1], strides = [1, 1]} : vector<32x16xf32> to vector<32x1xf32>
    %83 = vector.extract_strided_slice %11 {offsets = [0, 12], sizes = [32, 1], strides = [1, 1]} : vector<32x16xf32> to vector<32x1xf32>
    %84 = vector.broadcast %82 : vector<32x1xf32> to vector<32x128xf32>
    %85 = vector.broadcast %81 : vector<1x128xf32> to vector<32x128xf32>
    %86 = arith.mulf %84, %85 : vector<32x128xf32>
    %cst_17 = arith.constant 1.000000e+00 : f32
    %87 = vector.broadcast %cst_17 : f32 to vector<32x1xf32>
    %88 = arith.subf %87, %82 : vector<32x1xf32>
    %89 = vector.broadcast %88 : vector<32x1xf32> to vector<32x128xf32>
    %90 = arith.addf %86, %89 : vector<32x128xf32>
    %91 = arith.mulf %80, %90 : vector<32x128xf32>
    %92 = vector.broadcast %83 : vector<32x1xf32> to vector<32x128xf32>
    %93 = vector.broadcast %81 : vector<1x128xf32> to vector<32x128xf32>
    %94 = arith.mulf %92, %93 : vector<32x128xf32>
    %cst_18 = arith.constant 1.000000e+00 : f32
    %95 = vector.broadcast %cst_18 : f32 to vector<32x128xf32>
    %96 = arith.subf %95, %94 : vector<32x128xf32>
    %97 = arith.mulf %91, %96 : vector<32x128xf32>
    %98 = vector.extract_strided_slice %0 {offsets = [5, 0], sizes = [1, 128], strides = [1, 1]} : vector<8x128xf32> to vector<1x128xf32>
    %99 = vector.extract_strided_slice %11 {offsets = [0, 5], sizes = [32, 1], strides = [1, 1]} : vector<32x16xf32> to vector<32x1xf32>
    %100 = vector.extract_strided_slice %11 {offsets = [0, 13], sizes = [32, 1], strides = [1, 1]} : vector<32x16xf32> to vector<32x1xf32>
    %101 = vector.broadcast %99 : vector<32x1xf32> to vector<32x128xf32>
    %102 = vector.broadcast %98 : vector<1x128xf32> to vector<32x128xf32>
    %103 = arith.mulf %101, %102 : vector<32x128xf32>
    %cst_19 = arith.constant 1.000000e+00 : f32
    %104 = vector.broadcast %cst_19 : f32 to vector<32x1xf32>
    %105 = arith.subf %104, %99 : vector<32x1xf32>
    %106 = vector.broadcast %105 : vector<32x1xf32> to vector<32x128xf32>
    %107 = arith.addf %103, %106 : vector<32x128xf32>
    %108 = arith.mulf %97, %107 : vector<32x128xf32>
    %109 = vector.broadcast %100 : vector<32x1xf32> to vector<32x128xf32>
    %110 = vector.broadcast %98 : vector<1x128xf32> to vector<32x128xf32>
    %111 = arith.mulf %109, %110 : vector<32x128xf32>
    %cst_20 = arith.constant 1.000000e+00 : f32
    %112 = vector.broadcast %cst_20 : f32 to vector<32x128xf32>
    %113 = arith.subf %112, %111 : vector<32x128xf32>
    %114 = arith.mulf %108, %113 : vector<32x128xf32>
    %115 = vector.extract_strided_slice %0 {offsets = [6, 0], sizes = [1, 128], strides = [1, 1]} : vector<8x128xf32> to vector<1x128xf32>
    %116 = vector.extract_strided_slice %11 {offsets = [0, 6], sizes = [32, 1], strides = [1, 1]} : vector<32x16xf32> to vector<32x1xf32>
    %117 = vector.extract_strided_slice %11 {offsets = [0, 14], sizes = [32, 1], strides = [1, 1]} : vector<32x16xf32> to vector<32x1xf32>
    %118 = vector.broadcast %116 : vector<32x1xf32> to vector<32x128xf32>
    %119 = vector.broadcast %115 : vector<1x128xf32> to vector<32x128xf32>
    %120 = arith.mulf %118, %119 : vector<32x128xf32>
    %cst_21 = arith.constant 1.000000e+00 : f32
    %121 = vector.broadcast %cst_21 : f32 to vector<32x1xf32>
    %122 = arith.subf %121, %116 : vector<32x1xf32>
    %123 = vector.broadcast %122 : vector<32x1xf32> to vector<32x128xf32>
    %124 = arith.addf %120, %123 : vector<32x128xf32>
    %125 = arith.mulf %114, %124 : vector<32x128xf32>
    %126 = vector.broadcast %117 : vector<32x1xf32> to vector<32x128xf32>
    %127 = vector.broadcast %115 : vector<1x128xf32> to vector<32x128xf32>
    %128 = arith.mulf %126, %127 : vector<32x128xf32>
    %cst_22 = arith.constant 1.000000e+00 : f32
    %129 = vector.broadcast %cst_22 : f32 to vector<32x128xf32>
    %130 = arith.subf %129, %128 : vector<32x128xf32>
    %131 = arith.mulf %125, %130 : vector<32x128xf32>
    %132 = vector.extract_strided_slice %0 {offsets = [7, 0], sizes = [1, 128], strides = [1, 1]} : vector<8x128xf32> to vector<1x128xf32>
    %133 = vector.extract_strided_slice %11 {offsets = [0, 7], sizes = [32, 1], strides = [1, 1]} : vector<32x16xf32> to vector<32x1xf32>
    %134 = vector.extract_strided_slice %11 {offsets = [0, 15], sizes = [32, 1], strides = [1, 1]} : vector<32x16xf32> to vector<32x1xf32>
    %135 = vector.broadcast %133 : vector<32x1xf32> to vector<32x128xf32>
    %136 = vector.broadcast %132 : vector<1x128xf32> to vector<32x128xf32>
    %137 = arith.mulf %135, %136 : vector<32x128xf32>
    %cst_23 = arith.constant 1.000000e+00 : f32
    %138 = vector.broadcast %cst_23 : f32 to vector<32x1xf32>
    %139 = arith.subf %138, %133 : vector<32x1xf32>
    %140 = vector.broadcast %139 : vector<32x1xf32> to vector<32x128xf32>
    %141 = arith.addf %137, %140 : vector<32x128xf32>
    %142 = arith.mulf %131, %141 : vector<32x128xf32>
    %143 = vector.broadcast %134 : vector<32x1xf32> to vector<32x128xf32>
    %144 = vector.broadcast %132 : vector<1x128xf32> to vector<32x128xf32>
    %145 = arith.mulf %143, %144 : vector<32x128xf32>
    %cst_24 = arith.constant 1.000000e+00 : f32
    %146 = vector.broadcast %cst_24 : f32 to vector<32x128xf32>
    %147 = arith.subf %146, %145 : vector<32x128xf32>
    %148 = arith.mulf %142, %147 : vector<32x128xf32>
    %149 = vector.extract_strided_slice %10 {offsets = [0, 0], sizes = [32, 1], strides = [1, 1]} : vector<64x1xf32> to vector<32x1xf32>
    %150 = vector.broadcast %149 : vector<32x1xf32> to vector<32x128xf32>
    %151 = arith.mulf %150, %148 : vector<32x128xf32>
    %cst_25 = arith.constant 1.000000e+00 : f32
    %152 = vector.broadcast %cst_25 : f32 to vector<32x128xf32>
    %153 = arith.subf %152, %151 : vector<32x128xf32>
    %154 = vector.extract_strided_slice %153 {offsets = [0, 0], sizes = [16, 128], strides = [1, 1]} : vector<32x128xf32> to vector<16x128xf32>
    %155 = vector.extract_strided_slice %153 {offsets = [16, 0], sizes = [16, 128], strides = [1, 1]} : vector<32x128xf32> to vector<16x128xf32>
    %156 = arith.mulf %154, %155 : vector<16x128xf32>
    %157 = vector.extract_strided_slice %156 {offsets = [0, 0], sizes = [8, 128], strides = [1, 1]} : vector<16x128xf32> to vector<8x128xf32>
    %158 = vector.extract_strided_slice %156 {offsets = [8, 0], sizes = [8, 128], strides = [1, 1]} : vector<16x128xf32> to vector<8x128xf32>
    %159 = arith.mulf %157, %158 : vector<8x128xf32>
    %160 = vector.extract_strided_slice %159 {offsets = [0, 0], sizes = [4, 128], strides = [1, 1]} : vector<8x128xf32> to vector<4x128xf32>
    %161 = vector.extract_strided_slice %159 {offsets = [4, 0], sizes = [4, 128], strides = [1, 1]} : vector<8x128xf32> to vector<4x128xf32>
    %162 = arith.mulf %160, %161 : vector<4x128xf32>
    %163 = vector.extract_strided_slice %162 {offsets = [0, 0], sizes = [2, 128], strides = [1, 1]} : vector<4x128xf32> to vector<2x128xf32>
    %164 = vector.extract_strided_slice %162 {offsets = [2, 0], sizes = [2, 128], strides = [1, 1]} : vector<4x128xf32> to vector<2x128xf32>
    %165 = arith.mulf %163, %164 : vector<2x128xf32>
    %166 = vector.extract_strided_slice %165 {offsets = [0, 0], sizes = [1, 128], strides = [1, 1]} : vector<2x128xf32> to vector<1x128xf32>
    %167 = vector.extract_strided_slice %165 {offsets = [1, 0], sizes = [1, 128], strides = [1, 1]} : vector<2x128xf32> to vector<1x128xf32>
    %168 = arith.mulf %166, %167 : vector<1x128xf32>
    %cst_26 = arith.constant 1.000000e+00 : f32
    %169 = vector.broadcast %cst_26 : f32 to vector<1x128xf32>
    %170 = arith.subf %169, %168 : vector<1x128xf32>
    %171 = vector.extract_strided_slice %5 {offsets = [32, 0], sizes = [32, 16], strides = [1, 1]} : vector<64x16xf32> to vector<32x16xf32>
    %cst_27 = arith.constant 1.000000e+00 : f32
    %172 = vector.broadcast %cst_27 : f32 to vector<32x128xf32>
    %173 = vector.extract_strided_slice %0 {offsets = [0, 0], sizes = [1, 128], strides = [1, 1]} : vector<8x128xf32> to vector<1x128xf32>
    %174 = vector.extract_strided_slice %171 {offsets = [0, 0], sizes = [32, 1], strides = [1, 1]} : vector<32x16xf32> to vector<32x1xf32>
    %175 = vector.extract_strided_slice %171 {offsets = [0, 8], sizes = [32, 1], strides = [1, 1]} : vector<32x16xf32> to vector<32x1xf32>
    %176 = vector.broadcast %174 : vector<32x1xf32> to vector<32x128xf32>
    %177 = vector.broadcast %173 : vector<1x128xf32> to vector<32x128xf32>
    %178 = arith.mulf %176, %177 : vector<32x128xf32>
    %cst_28 = arith.constant 1.000000e+00 : f32
    %179 = vector.broadcast %cst_28 : f32 to vector<32x1xf32>
    %180 = arith.subf %179, %174 : vector<32x1xf32>
    %181 = vector.broadcast %180 : vector<32x1xf32> to vector<32x128xf32>
    %182 = arith.addf %178, %181 : vector<32x128xf32>
    %183 = arith.mulf %172, %182 : vector<32x128xf32>
    %184 = vector.broadcast %175 : vector<32x1xf32> to vector<32x128xf32>
    %185 = vector.broadcast %173 : vector<1x128xf32> to vector<32x128xf32>
    %186 = arith.mulf %184, %185 : vector<32x128xf32>
    %cst_29 = arith.constant 1.000000e+00 : f32
    %187 = vector.broadcast %cst_29 : f32 to vector<32x128xf32>
    %188 = arith.subf %187, %186 : vector<32x128xf32>
    %189 = arith.mulf %183, %188 : vector<32x128xf32>
    %190 = vector.extract_strided_slice %0 {offsets = [1, 0], sizes = [1, 128], strides = [1, 1]} : vector<8x128xf32> to vector<1x128xf32>
    %191 = vector.extract_strided_slice %171 {offsets = [0, 1], sizes = [32, 1], strides = [1, 1]} : vector<32x16xf32> to vector<32x1xf32>
    %192 = vector.extract_strided_slice %171 {offsets = [0, 9], sizes = [32, 1], strides = [1, 1]} : vector<32x16xf32> to vector<32x1xf32>
    %193 = vector.broadcast %191 : vector<32x1xf32> to vector<32x128xf32>
    %194 = vector.broadcast %190 : vector<1x128xf32> to vector<32x128xf32>
    %195 = arith.mulf %193, %194 : vector<32x128xf32>
    %cst_30 = arith.constant 1.000000e+00 : f32
    %196 = vector.broadcast %cst_30 : f32 to vector<32x1xf32>
    %197 = arith.subf %196, %191 : vector<32x1xf32>
    %198 = vector.broadcast %197 : vector<32x1xf32> to vector<32x128xf32>
    %199 = arith.addf %195, %198 : vector<32x128xf32>
    %200 = arith.mulf %189, %199 : vector<32x128xf32>
    %201 = vector.broadcast %192 : vector<32x1xf32> to vector<32x128xf32>
    %202 = vector.broadcast %190 : vector<1x128xf32> to vector<32x128xf32>
    %203 = arith.mulf %201, %202 : vector<32x128xf32>
    %cst_31 = arith.constant 1.000000e+00 : f32
    %204 = vector.broadcast %cst_31 : f32 to vector<32x128xf32>
    %205 = arith.subf %204, %203 : vector<32x128xf32>
    %206 = arith.mulf %200, %205 : vector<32x128xf32>
    %207 = vector.extract_strided_slice %0 {offsets = [2, 0], sizes = [1, 128], strides = [1, 1]} : vector<8x128xf32> to vector<1x128xf32>
    %208 = vector.extract_strided_slice %171 {offsets = [0, 2], sizes = [32, 1], strides = [1, 1]} : vector<32x16xf32> to vector<32x1xf32>
    %209 = vector.extract_strided_slice %171 {offsets = [0, 10], sizes = [32, 1], strides = [1, 1]} : vector<32x16xf32> to vector<32x1xf32>
    %210 = vector.broadcast %208 : vector<32x1xf32> to vector<32x128xf32>
    %211 = vector.broadcast %207 : vector<1x128xf32> to vector<32x128xf32>
    %212 = arith.mulf %210, %211 : vector<32x128xf32>
    %cst_32 = arith.constant 1.000000e+00 : f32
    %213 = vector.broadcast %cst_32 : f32 to vector<32x1xf32>
    %214 = arith.subf %213, %208 : vector<32x1xf32>
    %215 = vector.broadcast %214 : vector<32x1xf32> to vector<32x128xf32>
    %216 = arith.addf %212, %215 : vector<32x128xf32>
    %217 = arith.mulf %206, %216 : vector<32x128xf32>
    %218 = vector.broadcast %209 : vector<32x1xf32> to vector<32x128xf32>
    %219 = vector.broadcast %207 : vector<1x128xf32> to vector<32x128xf32>
    %220 = arith.mulf %218, %219 : vector<32x128xf32>
    %cst_33 = arith.constant 1.000000e+00 : f32
    %221 = vector.broadcast %cst_33 : f32 to vector<32x128xf32>
    %222 = arith.subf %221, %220 : vector<32x128xf32>
    %223 = arith.mulf %217, %222 : vector<32x128xf32>
    %224 = vector.extract_strided_slice %0 {offsets = [3, 0], sizes = [1, 128], strides = [1, 1]} : vector<8x128xf32> to vector<1x128xf32>
    %225 = vector.extract_strided_slice %171 {offsets = [0, 3], sizes = [32, 1], strides = [1, 1]} : vector<32x16xf32> to vector<32x1xf32>
    %226 = vector.extract_strided_slice %171 {offsets = [0, 11], sizes = [32, 1], strides = [1, 1]} : vector<32x16xf32> to vector<32x1xf32>
    %227 = vector.broadcast %225 : vector<32x1xf32> to vector<32x128xf32>
    %228 = vector.broadcast %224 : vector<1x128xf32> to vector<32x128xf32>
    %229 = arith.mulf %227, %228 : vector<32x128xf32>
    %cst_34 = arith.constant 1.000000e+00 : f32
    %230 = vector.broadcast %cst_34 : f32 to vector<32x1xf32>
    %231 = arith.subf %230, %225 : vector<32x1xf32>
    %232 = vector.broadcast %231 : vector<32x1xf32> to vector<32x128xf32>
    %233 = arith.addf %229, %232 : vector<32x128xf32>
    %234 = arith.mulf %223, %233 : vector<32x128xf32>
    %235 = vector.broadcast %226 : vector<32x1xf32> to vector<32x128xf32>
    %236 = vector.broadcast %224 : vector<1x128xf32> to vector<32x128xf32>
    %237 = arith.mulf %235, %236 : vector<32x128xf32>
    %cst_35 = arith.constant 1.000000e+00 : f32
    %238 = vector.broadcast %cst_35 : f32 to vector<32x128xf32>
    %239 = arith.subf %238, %237 : vector<32x128xf32>
    %240 = arith.mulf %234, %239 : vector<32x128xf32>
    %241 = vector.extract_strided_slice %0 {offsets = [4, 0], sizes = [1, 128], strides = [1, 1]} : vector<8x128xf32> to vector<1x128xf32>
    %242 = vector.extract_strided_slice %171 {offsets = [0, 4], sizes = [32, 1], strides = [1, 1]} : vector<32x16xf32> to vector<32x1xf32>
    %243 = vector.extract_strided_slice %171 {offsets = [0, 12], sizes = [32, 1], strides = [1, 1]} : vector<32x16xf32> to vector<32x1xf32>
    %244 = vector.broadcast %242 : vector<32x1xf32> to vector<32x128xf32>
    %245 = vector.broadcast %241 : vector<1x128xf32> to vector<32x128xf32>
    %246 = arith.mulf %244, %245 : vector<32x128xf32>
    %cst_36 = arith.constant 1.000000e+00 : f32
    %247 = vector.broadcast %cst_36 : f32 to vector<32x1xf32>
    %248 = arith.subf %247, %242 : vector<32x1xf32>
    %249 = vector.broadcast %248 : vector<32x1xf32> to vector<32x128xf32>
    %250 = arith.addf %246, %249 : vector<32x128xf32>
    %251 = arith.mulf %240, %250 : vector<32x128xf32>
    %252 = vector.broadcast %243 : vector<32x1xf32> to vector<32x128xf32>
    %253 = vector.broadcast %241 : vector<1x128xf32> to vector<32x128xf32>
    %254 = arith.mulf %252, %253 : vector<32x128xf32>
    %cst_37 = arith.constant 1.000000e+00 : f32
    %255 = vector.broadcast %cst_37 : f32 to vector<32x128xf32>
    %256 = arith.subf %255, %254 : vector<32x128xf32>
    %257 = arith.mulf %251, %256 : vector<32x128xf32>
    %258 = vector.extract_strided_slice %0 {offsets = [5, 0], sizes = [1, 128], strides = [1, 1]} : vector<8x128xf32> to vector<1x128xf32>
    %259 = vector.extract_strided_slice %171 {offsets = [0, 5], sizes = [32, 1], strides = [1, 1]} : vector<32x16xf32> to vector<32x1xf32>
    %260 = vector.extract_strided_slice %171 {offsets = [0, 13], sizes = [32, 1], strides = [1, 1]} : vector<32x16xf32> to vector<32x1xf32>
    %261 = vector.broadcast %259 : vector<32x1xf32> to vector<32x128xf32>
    %262 = vector.broadcast %258 : vector<1x128xf32> to vector<32x128xf32>
    %263 = arith.mulf %261, %262 : vector<32x128xf32>
    %cst_38 = arith.constant 1.000000e+00 : f32
    %264 = vector.broadcast %cst_38 : f32 to vector<32x1xf32>
    %265 = arith.subf %264, %259 : vector<32x1xf32>
    %266 = vector.broadcast %265 : vector<32x1xf32> to vector<32x128xf32>
    %267 = arith.addf %263, %266 : vector<32x128xf32>
    %268 = arith.mulf %257, %267 : vector<32x128xf32>
    %269 = vector.broadcast %260 : vector<32x1xf32> to vector<32x128xf32>
    %270 = vector.broadcast %258 : vector<1x128xf32> to vector<32x128xf32>
    %271 = arith.mulf %269, %270 : vector<32x128xf32>
    %cst_39 = arith.constant 1.000000e+00 : f32
    %272 = vector.broadcast %cst_39 : f32 to vector<32x128xf32>
    %273 = arith.subf %272, %271 : vector<32x128xf32>
    %274 = arith.mulf %268, %273 : vector<32x128xf32>
    %275 = vector.extract_strided_slice %0 {offsets = [6, 0], sizes = [1, 128], strides = [1, 1]} : vector<8x128xf32> to vector<1x128xf32>
    %276 = vector.extract_strided_slice %171 {offsets = [0, 6], sizes = [32, 1], strides = [1, 1]} : vector<32x16xf32> to vector<32x1xf32>
    %277 = vector.extract_strided_slice %171 {offsets = [0, 14], sizes = [32, 1], strides = [1, 1]} : vector<32x16xf32> to vector<32x1xf32>
    %278 = vector.broadcast %276 : vector<32x1xf32> to vector<32x128xf32>
    %279 = vector.broadcast %275 : vector<1x128xf32> to vector<32x128xf32>
    %280 = arith.mulf %278, %279 : vector<32x128xf32>
    %cst_40 = arith.constant 1.000000e+00 : f32
    %281 = vector.broadcast %cst_40 : f32 to vector<32x1xf32>
    %282 = arith.subf %281, %276 : vector<32x1xf32>
    %283 = vector.broadcast %282 : vector<32x1xf32> to vector<32x128xf32>
    %284 = arith.addf %280, %283 : vector<32x128xf32>
    %285 = arith.mulf %274, %284 : vector<32x128xf32>
    %286 = vector.broadcast %277 : vector<32x1xf32> to vector<32x128xf32>
    %287 = vector.broadcast %275 : vector<1x128xf32> to vector<32x128xf32>
    %288 = arith.mulf %286, %287 : vector<32x128xf32>
    %cst_41 = arith.constant 1.000000e+00 : f32
    %289 = vector.broadcast %cst_41 : f32 to vector<32x128xf32>
    %290 = arith.subf %289, %288 : vector<32x128xf32>
    %291 = arith.mulf %285, %290 : vector<32x128xf32>
    %292 = vector.extract_strided_slice %0 {offsets = [7, 0], sizes = [1, 128], strides = [1, 1]} : vector<8x128xf32> to vector<1x128xf32>
    %293 = vector.extract_strided_slice %171 {offsets = [0, 7], sizes = [32, 1], strides = [1, 1]} : vector<32x16xf32> to vector<32x1xf32>
    %294 = vector.extract_strided_slice %171 {offsets = [0, 15], sizes = [32, 1], strides = [1, 1]} : vector<32x16xf32> to vector<32x1xf32>
    %295 = vector.broadcast %293 : vector<32x1xf32> to vector<32x128xf32>
    %296 = vector.broadcast %292 : vector<1x128xf32> to vector<32x128xf32>
    %297 = arith.mulf %295, %296 : vector<32x128xf32>
    %cst_42 = arith.constant 1.000000e+00 : f32
    %298 = vector.broadcast %cst_42 : f32 to vector<32x1xf32>
    %299 = arith.subf %298, %293 : vector<32x1xf32>
    %300 = vector.broadcast %299 : vector<32x1xf32> to vector<32x128xf32>
    %301 = arith.addf %297, %300 : vector<32x128xf32>
    %302 = arith.mulf %291, %301 : vector<32x128xf32>
    %303 = vector.broadcast %294 : vector<32x1xf32> to vector<32x128xf32>
    %304 = vector.broadcast %292 : vector<1x128xf32> to vector<32x128xf32>
    %305 = arith.mulf %303, %304 : vector<32x128xf32>
    %cst_43 = arith.constant 1.000000e+00 : f32
    %306 = vector.broadcast %cst_43 : f32 to vector<32x128xf32>
    %307 = arith.subf %306, %305 : vector<32x128xf32>
    %308 = arith.mulf %302, %307 : vector<32x128xf32>
    %309 = vector.extract_strided_slice %10 {offsets = [32, 0], sizes = [32, 1], strides = [1, 1]} : vector<64x1xf32> to vector<32x1xf32>
    %310 = vector.broadcast %309 : vector<32x1xf32> to vector<32x128xf32>
    %311 = arith.mulf %310, %308 : vector<32x128xf32>
    %cst_44 = arith.constant 1.000000e+00 : f32
    %312 = vector.broadcast %cst_44 : f32 to vector<32x128xf32>
    %313 = arith.subf %312, %311 : vector<32x128xf32>
    %314 = vector.extract_strided_slice %313 {offsets = [0, 0], sizes = [16, 128], strides = [1, 1]} : vector<32x128xf32> to vector<16x128xf32>
    %315 = vector.extract_strided_slice %313 {offsets = [16, 0], sizes = [16, 128], strides = [1, 1]} : vector<32x128xf32> to vector<16x128xf32>
    %316 = arith.mulf %314, %315 : vector<16x128xf32>
    %317 = vector.extract_strided_slice %316 {offsets = [0, 0], sizes = [8, 128], strides = [1, 1]} : vector<16x128xf32> to vector<8x128xf32>
    %318 = vector.extract_strided_slice %316 {offsets = [8, 0], sizes = [8, 128], strides = [1, 1]} : vector<16x128xf32> to vector<8x128xf32>
    %319 = arith.mulf %317, %318 : vector<8x128xf32>
    %320 = vector.extract_strided_slice %319 {offsets = [0, 0], sizes = [4, 128], strides = [1, 1]} : vector<8x128xf32> to vector<4x128xf32>
    %321 = vector.extract_strided_slice %319 {offsets = [4, 0], sizes = [4, 128], strides = [1, 1]} : vector<8x128xf32> to vector<4x128xf32>
    %322 = arith.mulf %320, %321 : vector<4x128xf32>
    %323 = vector.extract_strided_slice %322 {offsets = [0, 0], sizes = [2, 128], strides = [1, 1]} : vector<4x128xf32> to vector<2x128xf32>
    %324 = vector.extract_strided_slice %322 {offsets = [2, 0], sizes = [2, 128], strides = [1, 1]} : vector<4x128xf32> to vector<2x128xf32>
    %325 = arith.mulf %323, %324 : vector<2x128xf32>
    %326 = vector.extract_strided_slice %325 {offsets = [0, 0], sizes = [1, 128], strides = [1, 1]} : vector<2x128xf32> to vector<1x128xf32>
    %327 = vector.extract_strided_slice %325 {offsets = [1, 0], sizes = [1, 128], strides = [1, 1]} : vector<2x128xf32> to vector<1x128xf32>
    %328 = arith.mulf %326, %327 : vector<1x128xf32>
    %cst_45 = arith.constant 1.000000e+00 : f32
    %329 = vector.broadcast %cst_45 : f32 to vector<1x128xf32>
    %330 = arith.subf %329, %328 : vector<1x128xf32>
    %331 = tpu.concatenate %170, %330 in 0 : vector<1x128xf32>, vector<1x128xf32> -> vector<2x128xf32>
    %c0_46 = arith.constant 0 : index
    %c0_47 = arith.constant 0 : index
    %332 = vector.load %arg4[%c0_46, %c0_47] : memref<2x128xf32, #tpu.memory_space<vmem>>, vector<2x128xf32>
    tpu.vector_store %arg4[%c0_46, %c0_47], %331 {strides = array<i32>} : memref<2x128xf32, #tpu.memory_space<vmem>>, vector<2x128xf32>,
    return
  }
  func.func @transform_0(%arg0: i32) -> (i32, i32) {
    %c0_i32 = arith.constant 0 : i32
    %c0_i32_0 = arith.constant 0 : i32
    return %c0_i32, %arg0 : i32, i32
  }
  func.func @transform_1(%arg0: i32) -> (i32, i32) {
    %c0_i32 = arith.constant 0 : i32
    %c0_i32_0 = arith.constant 0 : i32
    %c0_i32_1 = arith.constant 0 : i32
    return %c0_i32, %c0_i32_0 : i32, i32
  }
  func.func @transform_2(%arg0: i32) -> (i32, i32) {
    %c0_i32 = arith.constant 0 : i32
    %c0_i32_0 = arith.constant 0 : i32
    %c0_i32_1 = arith.constant 0 : i32
    return %c0_i32, %c0_i32_0 : i32, i32
  }
  func.func @transform_3(%arg0: i32) -> (i32, i32) {
    %c0_i32 = arith.constant 0 : i32
    %c0_i32_0 = arith.constant 0 : i32
    return %c0_i32, %arg0 : i32, i32
  }
}

</mosaic_0001>

<bundles_post_ra>
// kernel: tpu_custom_call.1
= control target key start
LH: loop header
LB: loop body
LE: loop exit
PB: predicated region body
PF: predicated region fallthrough
CT: control target
= control target key end

     0   :  { %8 = vsyncpa [#allocation3], 0  ;;  %s2801_s0 = inlined_call_operand.vmem [shape: f32[8,256], index: 0, kind: input, shape index: {}]   ;;  %s2802_s1 = inlined_call_operand.vmem [shape: f32[64,16], index: 1, kind: input, shape index: {}]   ;;  %s2803_s2 = inlined_call_operand.vmem [shape: f32[64,1], index: 2, kind: input, shape index: {}]   ;;  %s2804_s3 = inlined_call_operand.hbm [shape: f32[2,256], index: 3, kind: output, shape index: {}]  }
   0x1   :  { %10 = vsyncpa [#allocation3 + $0x1], 0  ;;  %s1798_s12 = smov 0   ;;  %s1800_s13 = smov 0  }
   0x2   :  { %s1802_s14 = smov 0   ;;  %s1804_s15 = smov 0  }
   0x3 LB: > { %s1819_s16 = sadd.s32 4294967295, %s1759_s15   ;;  %s1582_s17 = sadd.s32 4294967294, %s1759_s15   ;;  %s1759_s15 = sphi %s1804_s15, %s2979_s15   ;;  %s1755_s14 = sphi %s1802_s14, %s2978_s14   ;;  %s1751_s13 = sphi %s1800_s13, %s2977_s13   ;;  %s1747_s12 = sphi %s1798_s12, %s2976_s12  }
   0x4   : > { %s1823_s18 = sadd.s32 1, %s1759_s15   ;;  %s91_s19 = sadd.s32 1, %s1755_s14 }
   0x5   : > { %s88_s20 = ssub.s32 %s1759_s15, %s1823_s18  ;;  %p101_p0 = scmp.ne.s32.totalorder %s1755_s14, %s1751_s13 }
   0x6   : > { %p89_p1 = scmp.eq.s32.totalorder %s88_s20, 0  ;;  %p102_p2 = scmp.eq.s32.totalorder %s1819_s16, 1 }
   0x7   : > { %p107_p3 = scmp.ne.s32.totalorder %s1751_s13, %s1747_s12  ;;  %p108_p4 = scmp.eq.s32.totalorder %s1582_s17, 1 }
   0x8   : > { %s1834_s21 = scalar_select %p89_p1, %s1755_s14, %s91_s19  }
   0x9   : > { %p1836_p5 = por %p102_p2, %p101_p0  ;;  %p1840_p6 = por %p108_p4, %p107_p3 }
   0xa   : > { %p1585_p7 = scmp.ge.s32.totalorder %s1759_s15, 1  ;;  %p139_p8 = scmp.lt.s32.totalorder %s1759_s15, 3 }
   0xc   : > { %p140_p9 = pnand %p1585_p7, %p139_p8 }
   0xe   : > { %143 = sbr.rel (%p140_p9) target bundleno = 685 (0x2ad), region = 32 }
  0x15   : > { %v169_v0 = vld [vmem:[%s2802_s1 + $0x10] sm:$0xff]  ;;  %v167_v1 = vld [vmem:[%s2802_s1] sm:$0xff]  ;;  %v170_v2 = vld [vmem:[%s2802_s1 + $0x18] sm:$0xff]  ;;  %v2822_v3 = vmov 0   ;;  %v2817_v23 = vmov 8   ;;  %v2816_v28 = vmov 1  }
  0x16   : > { %1648 = vset.pattern.permute.xlu1 %v2822_v3  ;;  %1647 = vset.pattern.permute.xlu0 %v2822_v3  ;;  %v177_v4 = vmax.f32 %v169_v0, 0.0  ;;  %v175_v5 = vmax.f32 %v167_v1, 0.0  ;;  %v178_v6 = vmax.f32 %v170_v2, 0.0  ;;  %v168_v7 = vld [vmem:[%s2802_s1 + $0x8] sm:$0xff]  ;;  %v171_v19 = vld [vmem:[%s2802_s1 + $0x20] sm:$0xff]  ;;  %v173_v22 = vld [vmem:[%s2802_s1 + $0x30] sm:$0xff] }
  0x17   : > { %v176_v8 = vmax.f32 %v168_v7, 0.0  ;;  %v192_v15 = vld [vmem:[%s2803_s2 + $0x8] sm:$0xff]  ;;  %v179_v21 = vmax.f32 %v171_v19, 0.0  ;;  %v181_v25 = vmax.f32 %v173_v22, 0.0  ;;  %v174_v30 = vld [vmem:[%s2802_s1 + $0x38] sm:$0xff]  ;;  %v2810_v33 = vmov 9  }
  0x18   : > { %v1860_v9 = vmin.f32 %v177_v4, 1.0  ;;  %v1862_v10 = vmin.f32 %v175_v5, 1.0  ;;  %v1866_v11 = vmin.f32 %v178_v6, 1.0  ;;  %v200_v18 = vmax.f32 %v192_v15, 0.0  ;;  %v172_v35 = vld [vmem:[%s2802_s1 + $0x28] sm:$0xff]  ;;  %v191_v3 = vld [vmem:[%s2803_s2] sm:$0xff] }
  0x19   : > { %v1868_v12 = vmin.f32 %v176_v8, 1.0  ;;  %v1898_v24 = vmin.f32 %v179_v21, 1.0  ;;  %v1902_v26 = vmin.f32 %v181_v25, 1.0  ;;  %v182_v31 = vmax.f32 %v174_v30, 0.0  ;;  %p162_p10 = scmp.lt.s32.totalorder %s1819_s16, 1  ;;  %s159_s25 = sand.u32 1, %s1751_s13  }
  0x1a   : > { %2835 = vst [vmem:[#allocation5_spill] sm:$0xff] %v1862_v10  ;;  %227 = vperm.xlu1 %1648, %v1860_v9   ;;  %217 = vperm.xlu0 %1647, %v1862_v10   ;;  %v1876_v14 = vsub.f32 1.0, %v1862_v10  ;;  %v1884_v16 = vsub.f32 1.0, %v1866_v11  ;;  %v1887_v17 = vsub.f32 1.0, %v1860_v9  ;;  %v208_v20 = vmin.f32 %v200_v18, 1.0  ;;  %s1586_s26 = sshll.u32 %s159_s25, 1 }
  0x1b   : > { %v1873_v13 = vsub.f32 1.0, %v1868_v12  ;;  %v1907_v27 = vsub.f32 1.0, %v1898_v24  ;;  %v1913_v29 = vsub.f32 1.0, %v1902_v26  ;;  %v1927_v32 = vmin.f32 %v182_v31, 1.0  ;;  %s163_s30 = scalar_select %p162_p10, %s1819_s16, 1 }
  0x1c   : > { %v2809_v34 = vmov 2   ;;  %v180_v36 = vmax.f32 %v172_v35, 0.0  ;;  %v2808_v38 = vmov 10   ;;  %v2807_v39 = vmov 3   ;;  %s1589_s27 = sshll.u32 %s1819_s16, 5  ;;  %s161_s28 = scalar_lea.vmem [#allocation2], %s1586_s26 }
  0x1d   : > { %2836 = vst [vmem:[#allocation6_spill] sm:$0xff] %v1913_v29  ;;  %v2806_v40 = vmov 11   ;;  %v2805_v41 = vmov 4   ;;  %v2813_v48 = vmov 12   ;;  %v2824_v53 = vmov 5   ;;  %s1587_s4 = sshll.u32 %s163_s30, 3  ;;  %s2759_s5 = scalar_lea.hbm %s2804_s3, %s1589_s27 }
  0x1e   : > { %232 = vperm.xlu1 %1648, %v1866_v11   ;;  %222 = vperm.xlu0 %1647, %v1868_v12   ;;  %v1943_v37 = vmin.f32 %v180_v36, 1.0  ;;  %v2820_v0 = vmov 13   ;;  %v2818_v6 = vmov 6   ;;  %v2811_v31 = vmov 14   ;;  %s165_s7 = scalar_lea.vmem %s2801_s0, %s1587_s4  ;;  %s1523_s29 = sshll.u32 %s161_s28, 4  ;;  %s2761_s29 = int_to_ptr.vmem [resolvable:$true] %s1523_s29 }
  0x1f   : > { %vm1506_vm0 = vcmask 1040384   ;;  %s1510_s6 = scalar_lea.sflag [#allocation3], %s159_s25  ;;  %s1777_s16 = smov [#allocation2]  }
  0x20   : > { %s1701_s8 = sshll.u32 %s1777_s16, 4  ;;  %s1702_s8 = int_to_ptr.vmem [resolvable:$false] %s1701_s8 }
  0x21   : > { %s1703_s9 = scalar_lea.vmem %s1702_s8, 64  ;;  %p1704_p0 = scmp.lt.s32.totalorder %s2761_s29, %s1702_s8 }
  0x22   : > { %254 = vperm.xlu1 %1648, %v1873_v13   ;;  %249 = vperm.xlu0 %1647, %v1876_v14  }
  0x26   : > { %264 = vperm.xlu1 %1648, %v1884_v16   ;;  %259 = vperm.xlu0 %1647, %v1887_v17  }
  0x2a   : > { %1649 = vset.pattern.permute.xlu1 %v2817_v23  ;;  %838 = vperm.xlu0 %1647, %v208_v20  }
  0x2b   : > { %276 = vperm.xlu1 %1649, %v1868_v12  }
  0x2e   : > { %877 = vperm.xlu0 %1647, %v1898_v24  }
  0x2f   : > { %280 = vperm.xlu1 %1649, %v1860_v9  }
  0x32   : > { %887 = vperm.xlu0 %1647, %v1902_v26  }
  0x33   : > { %1650 = vset.pattern.permute.xlu1 %v2816_v28 }
  0x34   : > { %300 = vperm.xlu1 %1650, %v1862_v10  }
  0x36   : > { %905 = vperm.xlu0 %1647, %v1907_v27  }
  0x38   : > { %308 = vperm.xlu1 %1650, %v1860_v9  }
  0x3a   : > { %915 = vperm.xlu0 %1647, %v1913_v29  }
  0x3c   : > { %312 = vperm.xlu1 %1650, %v1866_v11  }
  0x3e   : > { %1665 = vset.pattern.permute.xlu0 %v2817_v23 }
  0x3f   : > { %272 = vperm.xlu0 %1665, %v1862_v10  }
  0x40   : > { %328 = vperm.xlu1 %1650, %v1873_v13  }
  0x43   : > { %284 = vperm.xlu0 %1665, %v1866_v11  }
  0x44   : > { %336 = vperm.xlu1 %1650, %v1884_v16  }
  0x47   : > { %928 = vperm.xlu0 %1665, %v1898_v24  }
  0x48   : > { %1651 = vset.pattern.permute.xlu1 %v2810_v33 }
  0x49   : > { %352 = vperm.xlu1 %1651, %v1868_v12  }
  0x4b   : > { %940 = vperm.xlu0 %1665, %v1927_v32  }
  0x4d   : > { %356 = vperm.xlu1 %1651, %v1860_v9  }
  0x4f   : > { %1667 = vset.pattern.permute.xlu0 %v2816_v28 }
  0x50   : > { %304 = vperm.xlu0 %1667, %v1868_v12  }
  0x51   : > { %1652 = vset.pattern.permute.xlu1 %v2809_v34 }
  0x52   : > { %376 = vperm.xlu1 %1652, %v1862_v10  }
  0x54   : > { %324 = vperm.xlu0 %1667, %v1876_v14  }
  0x56   : > { %384 = vperm.xlu1 %1652, %v1860_v9  }
  0x58   : > { %332 = vperm.xlu0 %1667, %v1887_v17  }
  0x5a   : > { %388 = vperm.xlu1 %1652, %v1866_v11  }
  0x5c   : > { %960 = vperm.xlu0 %1667, %v1943_v37  }
  0x5e   : > { %404 = vperm.xlu1 %1652, %v1873_v13  }
  0x60   : > { %976 = vperm.xlu0 %1667, %v1907_v27  }
  0x62   : > { %412 = vperm.xlu1 %1652, %v1884_v16  }
  0x64   : > { %984 = vperm.xlu0 %1667, %v1913_v29  }
  0x66   : > { %1653 = vset.pattern.permute.xlu1 %v2808_v38 }
  0x67   : > { %428 = vperm.xlu1 %1653, %v1868_v12  }
  0x68   : > { %1669 = vset.pattern.permute.xlu0 %v2810_v33 }
  0x69   : > { %348 = vperm.xlu0 %1669, %v1862_v10  }
  0x6b   : > { %432 = vperm.xlu1 %1653, %v1860_v9  }
  0x6d   : > { %360 = vperm.xlu0 %1669, %v1866_v11  }
  0x6f   : > { %1654 = vset.pattern.permute.xlu1 %v2807_v39 }
  0x70   : > { %452 = vperm.xlu1 %1654, %v1862_v10  }
  0x71   : > { %1000 = vperm.xlu0 %1669, %v1898_v24  }
  0x74   : > { %460 = vperm.xlu1 %1654, %v1860_v9  }
  0x75   : > { %1012 = vperm.xlu0 %1669, %v1927_v32  }
  0x78   : > { %464 = vperm.xlu1 %1654, %v1866_v11  }
  0x79   : > { %1671 = vset.pattern.permute.xlu0 %v2809_v34 }
  0x7a   : > { %380 = vperm.xlu0 %1671, %v1868_v12  }
  0x7c   : > { %480 = vperm.xlu1 %1654, %v1873_v13  }
  0x7e   : > { %400 = vperm.xlu0 %1671, %v1876_v14  }
  0x80   : > { %488 = vperm.xlu1 %1654, %v1884_v16  }
  0x82   : > { %408 = vperm.xlu0 %1671, %v1887_v17  }
  0x84   : > { %1655 = vset.pattern.permute.xlu1 %v2806_v40 }
  0x85   : > { %504 = vperm.xlu1 %1655, %v1868_v12  }
  0x86   : > { %1032 = vperm.xlu0 %1671, %v1943_v37  }
  0x89   : > { %508 = vperm.xlu1 %1655, %v1860_v9  }
  0x8a   : > { %1048 = vperm.xlu0 %1671, %v1907_v27  }
  0x8d   : > { %1656 = vset.pattern.permute.xlu1 %v2805_v41 }
  0x8e   : > { %528 = vperm.xlu1 %1656, %v1862_v10   ;;  %1056 = vperm.xlu0 %1671, %v1913_v29  }
  0x92   : > { %536 = vperm.xlu1 %1656, %v1860_v9   ;;  %1673 = vset.pattern.permute.xlu0 %v2808_v38 }
  0x93   : > { %424 = vperm.xlu0 %1673, %v1862_v10  }
  0x96   : > { %540 = vperm.xlu1 %1656, %v1866_v11  }
  0x97   : > { %436 = vperm.xlu0 %1673, %v1866_v11  }
  0x99   : > { %v1982_v42 = vpop.permute.xlu1 %227  ;;  %v1984_v43 = vpop.permute.xlu0 %217 }
  0x9a   : > { %556 = vperm.xlu1 %1656, %v1873_v13  }
  0x9b   : > { %1072 = vperm.xlu0 %1673, %v1898_v24  }
  0x9d   : > { %v1988_v44 = vpop.permute.xlu1 %232  ;;  %v1990_v45 = vpop.permute.xlu0 %222 }
  0x9e   : > { %564 = vperm.xlu1 %1656, %v1884_v16  }
  0x9f   : > { %1084 = vperm.xlu0 %1673, %v1927_v32  }
  0xa1   : > { %v1994_v46 = vpop.permute.xlu1 %254  ;;  %v1996_v47 = vpop.permute.xlu0 %249 }
  0xa2   : > { %2837 = vst [vmem:[#allocation7_spill] sm:$0xff] %v1994_v46  ;;  %1657 = vset.pattern.permute.xlu1 %v2813_v48 }
  0xa3   : > { %580 = vperm.xlu1 %1657, %v1868_v12   ;;  %1675 = vset.pattern.permute.xlu0 %v2807_v39  ;;  %v2814_v39 = vmov 7  }
  0xa4   : > { %456 = vperm.xlu0 %1675, %v1868_v12  }
  0xa5   : > { %v2002_v49 = vpop.permute.xlu1 %264  ;;  %v2004_v50 = vpop.permute.xlu0 %259 }
  0xa7   : > { %584 = vperm.xlu1 %1657, %v1860_v9  }
  0xa8   : > { %476 = vperm.xlu0 %1675, %v1876_v14  }
  0xa9   : > { %v2008_v51 = vpop.permute.xlu0 %838 }
  0xaa   : > { %2838 = vst [vmem:[#allocation8_spill] sm:$0xff] %v2008_v51  ;;  %v2010_v52 = vpop.permute.xlu1 %276  ;;  %v2825_v51 = vmov 15  }
  0xab   : > { %1658 = vset.pattern.permute.xlu1 %v2824_v53 }
  0xac   : > { %604 = vperm.xlu1 %1658, %v1862_v10   ;;  %484 = vperm.xlu0 %1675, %v1887_v17  }
  0xad   : > { %v2015_v54 = vpop.permute.xlu0 %877 }
  0xae   : > { %2839 = vst [vmem:[#allocation9_spill] sm:$0xff] %v2015_v54  ;;  %v2017_v55 = vpop.permute.xlu1 %280 }
  0xb0   : > { %612 = vperm.xlu1 %1658, %v1860_v9   ;;  %1104 = vperm.xlu0 %1675, %v1943_v37  }
  0xb1   : > { %v2021_v56 = vpop.permute.xlu0 %887 }
  0xb2   : > { %2840 = vst [vmem:[#allocation10_spill] sm:$0xff] %v2021_v56 }
  0xb3   : > { %v2023_v57 = vpop.permute.xlu1 %300 }
  0xb4   : > { %616 = vperm.xlu1 %1658, %v1866_v11   ;;  %1120 = vperm.xlu0 %1675, %v1907_v27  }
  0xb5   : > { %v2027_v58 = vpop.permute.xlu0 %905 }
  0xb6   : > { %2841 = vst [vmem:[#allocation11_spill] sm:$0xff] %v2027_v58 }
  0xb7   : > { %v2029_v59 = vpop.permute.xlu1 %308 }
  0xb8   : > { %632 = vperm.xlu1 %1658, %v1873_v13   ;;  %1128 = vperm.xlu0 %1675, %v1913_v29  }
  0xb9   : > { %v2033_v60 = vpop.permute.xlu0 %915 }
  0xba   : > { %2842 = vst [vmem:[#allocation12_spill] sm:$0xff] %v2033_v60 }
  0xbb   : > { %v2035_v61 = vpop.permute.xlu1 %312 }
  0xbc   : > { %640 = vperm.xlu1 %1658, %v1884_v16   ;;  %1677 = vset.pattern.permute.xlu0 %v2806_v40 }
  0xbd   : > { %500 = vperm.xlu0 %1677, %v1862_v10  }
  0xbe   : > { %v2040_v62 = vpop.permute.xlu0 %272 }
  0xbf   : > { %v2042_v63 = vpop.permute.xlu1 %328 }
  0xc0   : > { %2843 = vst [vmem:[#allocation13_spill] sm:$0xff] %v2042_v63  ;;  %1659 = vset.pattern.permute.xlu1 %v2820_v0 }
  0xc1   : > { %656 = vperm.xlu1 %1659, %v1868_v12   ;;  %512 = vperm.xlu0 %1677, %v1866_v11  }
  0xc2   : > { %v2047_v1 = vpop.permute.xlu0 %284 }
  0xc3   : > { %v2049_v2 = vpop.permute.xlu1 %336 }
  0xc5   : > { %660 = vperm.xlu1 %1659, %v1860_v9   ;;  %1144 = vperm.xlu0 %1677, %v1898_v24  }
  0xc6   : > { %v2053_v4 = vpop.permute.xlu0 %928 }
  0xc7   : > { %2844 = vst [vmem:[#allocation14_spill] sm:$0xff] %v2053_v4  ;;  %v194_v4 = vld [vmem:[%s2803_s2 + $0x18] sm:$0xff] }
  0xc8   : > { %v2055_v5 = vpop.permute.xlu1 %352 }
  0xc9   : > { %2845 = vst [vmem:[#allocation15_spill] sm:$0xff] %v2055_v5  ;;  %1660 = vset.pattern.permute.xlu1 %v2818_v6  ;;  %1156 = vperm.xlu0 %1677, %v1927_v32   ;;  %v2884_v5 = vmov 9  }
  0xca   : > { %680 = vperm.xlu1 %1660, %v1862_v10   ;;  %v2060_v7 = vpop.permute.xlu0 %940 }
  0xcb   : > { %2846 = vst [vmem:[#allocation16_spill] sm:$0xff] %v2060_v7 }
  0xcc   : > { %v2062_v8 = vpop.permute.xlu1 %356 }
  0xcd   : > { %1679 = vset.pattern.permute.xlu0 %v2805_v41 }
  0xce   : > { %688 = vperm.xlu1 %1660, %v1860_v9   ;;  %532 = vperm.xlu0 %1679, %v1868_v12  }
  0xcf   : > { %v2067_v15 = vpop.permute.xlu0 %304 }
  0xd1   : > { %v2069_v18 = vpop.permute.xlu1 %376 }
  0xd2   : > { %692 = vperm.xlu1 %1660, %v1866_v11   ;;  %552 = vperm.xlu0 %1679, %v1876_v14  }
  0xd3   : > { %v2073_v19 = vpop.permute.xlu0 %324 }
  0xd5   : > { %v2075_v20 = vpop.permute.xlu1 %384 }
  0xd6   : > { %708 = vperm.xlu1 %1660, %v1873_v13   ;;  %560 = vperm.xlu0 %1679, %v1887_v17  }
  0xd7   : > { %v2079_v21 = vpop.permute.xlu0 %332 }
  0xd9   : > { %v2081_v22 = vpop.permute.xlu1 %388 }
  0xda   : > { %716 = vperm.xlu1 %1660, %v1884_v16   ;;  %1176 = vperm.xlu0 %1679, %v1943_v37  }
  0xdb   : > { %v2085_v25 = vpop.permute.xlu0 %960 }
  0xdc   : > { %2847 = vst [vmem:[#allocation17_spill] sm:$0xff] %v2085_v25  ;;  %v2863_v25 = vmov 13  }
  0xdd   : > { %v2087_v30 = vpop.permute.xlu1 %404 }
  0xde   : > { %2848 = vst [vmem:[#allocation18_spill] sm:$0xff] %v2087_v30  ;;  %1661 = vset.pattern.permute.xlu1 %v2811_v31  ;;  %1192 = vperm.xlu0 %1679, %v1907_v27  }
  0xdf   : > { %732 = vperm.xlu1 %1661, %v1868_v12   ;;  %v2092_v35 = vpop.permute.xlu0 %976 }
  0xe0   : > { %2849 = vst [vmem:[#allocation19_spill] sm:$0xff] %v2092_v35  ;;  %v193_v35 = vld [vmem:[%s2803_s2 + $0x10] sm:$0xff] }
  0xe1   : > { %v2094_v36 = vpop.permute.xlu1 %412  ;;  %v201_v58 = vmax.f32 %v193_v35, 0.0 }
  0xe2   : > { %1200 = vperm.xlu0 %1679, %v1913_v29  }
  0xe3   : > { %736 = vperm.xlu1 %1661, %v1860_v9   ;;  %v2098_v41 = vpop.permute.xlu0 %984  ;;  %v209_v7 = vmin.f32 %v201_v58, 1.0 }
  0xe4   : > { %2850 = vst [vmem:[#allocation20_spill] sm:$0xff] %v2098_v41  ;;  %v202_v41 = vmax.f32 %v194_v4, 0.0 }
  0xe6   : > { %v2100_v40 = vpop.permute.xlu1 %428  ;;  %1681 = vset.pattern.permute.xlu0 %v2813_v48 }
  0xe7   : > { %2851 = vst [vmem:[#allocation21_spill] sm:$0xff] %v2100_v40  ;;  %1662 = vset.pattern.permute.xlu1 %v2814_v39  ;;  %576 = vperm.xlu0 %1681, %v1862_v10  }
  0xe8   : > { %756 = vperm.xlu1 %1662, %v1862_v10   ;;  %v2106_v38 = vpop.permute.xlu0 %348 }
  0xea   : > { %v2108_v34 = vpop.permute.xlu1 %432 }
  0xeb   : > { %588 = vperm.xlu0 %1681, %v1866_v11  }
  0xec   : > { %764 = vperm.xlu1 %1662, %v1860_v9   ;;  %v2112_v33 = vpop.permute.xlu0 %360 }
  0xef   : > { %v2114_v31 = vpop.permute.xlu1 %452  ;;  %1216 = vperm.xlu0 %1681, %v1898_v24  }
  0xf0   : > { %768 = vperm.xlu1 %1662, %v1866_v11   ;;  %v2118_v48 = vpop.permute.xlu0 %1000 }
  0xf1   : > { %2852 = vst [vmem:[#allocation22_spill] sm:$0xff] %v2118_v48 }
  0xf3   : > { %v2120_v39 = vpop.permute.xlu1 %460  ;;  %1228 = vperm.xlu0 %1681, %v1927_v32  }
  0xf4   : > { %784 = vperm.xlu1 %1662, %v1873_v13   ;;  %v2124_v28 = vpop.permute.xlu0 %1012 }
  0xf5   : > { %2853 = vst [vmem:[#allocation23_spill] sm:$0xff] %v2124_v28 }
  0xf7   : > { %v2126_v23 = vpop.permute.xlu1 %464  ;;  %1683 = vset.pattern.permute.xlu0 %v2824_v53 }
  0xf8   : > { %2854 = vst [vmem:[#allocation24_spill] sm:$0xff] %v2126_v23  ;;  %792 = vperm.xlu1 %1662, %v1884_v16   ;;  %608 = vperm.xlu0 %1683, %v1868_v12   ;;  %v199_v16 = vmax.f32 %v191_v3, 0.0  ;;  %v2859_v3 = vmov 0  }
  0xf9   : > { %v2131_v6 = vpop.permute.xlu0 %380 }
  0xfa   : > { %2855 = vst [vmem:[#allocation25_spill] sm:$0xff] %v2131_v6 }
  0xfb   : > { %v2133_v0 = vpop.permute.xlu1 %480 }
  0xfc   : > { %2856 = vst [vmem:[#allocation26_spill] sm:$0xff] %v2133_v0  ;;  %1663 = vset.pattern.permute.xlu1 %v2825_v51  ;;  %628 = vperm.xlu0 %1683, %v1876_v14   ;;  %v207_v51 = vmin.f32 %v199_v16, 1.0  ;;  %v210_v16 = vmin.f32 %v202_v41, 1.0 }
  0xfd   : > { %808 = vperm.xlu1 %1663, %v1868_v12   ;;  %v2141_v13 = vpop.permute.xlu0 %400 }
  0xff   : > { %v2143_v53 = vpop.permute.xlu1 %488 }
 0x100   : > { %2857 = vst [vmem:[#allocation27_spill] sm:$0xff] %v2143_v53  ;;  %636 = vperm.xlu0 %1683, %v1887_v17  }
 0x101   : > { %812 = vperm.xlu1 %1663, %v1860_v9   ;;  %v2150_v48 = vpop.permute.xlu0 %408 }
 0x104   : > { %v2155_v54 = vpop.permute.xlu1 %504  ;;  %1248 = vperm.xlu0 %1683, %v1943_v37  }
 0x105   : > { %2858 = vst [vmem:[#allocation28_spill] sm:$0xff] %v2155_v54  ;;  %1664 = vset.pattern.permute.xlu1 %v2859_v3  ;;  %v2159_v28 = vpop.permute.xlu0 %1032  ;;  %v2869_v3 = vmov 6  }
 0x106   : > { %2860 = vst [vmem:[#allocation29_spill] sm:$0xff] %v2159_v28  ;;  %833 = vperm.xlu1 %1664, %v207_v51   ;;  %v2194_v28 = vsub.f32 1.0, %v1927_v32 }
 0x108   : > { %v2161_v9 = vpop.permute.xlu1 %508  ;;  %1264 = vperm.xlu0 %1683, %v1907_v27  }
 0x109   : > { %v2164_v35 = vpop.permute.xlu0 %1048 }
 0x10a   : > { %2861 = vst [vmem:[#allocation30_spill] sm:$0xff] %v2164_v35  ;;  %843 = vperm.xlu1 %1664, %v209_v7   ;;  %v2185_v7 = vsub.f32 1.0, %v1943_v37 }
 0x10c   : > { %1272 = vperm.xlu0 %1683, %v1913_v29  }
 0x10d   : > { %v2167_v60 = vpop.permute.xlu1 %528  ;;  %v2169_v56 = vpop.permute.xlu0 %1056 }
 0x10e   : > { %2862 = vst [vmem:[#allocation31_spill] sm:$0xff] %v2169_v56  ;;  %848 = vperm.xlu1 %1664, %v210_v16  }
 0x110   : > { %1685 = vset.pattern.permute.xlu0 %v2863_v25 }
 0x111   : > { %v2172_v51 = vpop.permute.xlu1 %536  ;;  %652 = vperm.xlu0 %1685, %v1862_v10  }
 0x112   : > { %882 = vperm.xlu1 %1664, %v1943_v37   ;;  %v2176_v58 = vpop.permute.xlu0 %424 }
 0x115   : > { %v2178_v4 = vpop.permute.xlu1 %540  ;;  %664 = vperm.xlu0 %1685, %v1866_v11  }
 0x116   : > { %2864 = vst [vmem:[#allocation32_spill] sm:$0xff] %v2178_v4  ;;  %892 = vperm.xlu1 %1664, %v1927_v32   ;;  %v2182_v41 = vpop.permute.xlu0 %436 }
 0x119   : > { %v2187_v16 = vpop.permute.xlu1 %556  ;;  %1288 = vperm.xlu0 %1685, %v1898_v24  }
 0x11a   : > { %2865 = vst [vmem:[#allocation33_spill] sm:$0xff] %v2187_v16  ;;  %910 = vperm.xlu1 %1664, %v2185_v7   ;;  %v2191_v35 = vpop.permute.xlu0 %1072  ;;  %v2870_v16 = vmov 8  }
 0x11b   : > { %2866 = vst [vmem:[#allocation34_spill] sm:$0xff] %v2191_v35 }
 0x11d   : > { %v2196_v56 = vpop.permute.xlu1 %564  ;;  %1300 = vperm.xlu0 %1685, %v1927_v32  }
 0x11e   : > { %2867 = vst [vmem:[#allocation35_spill] sm:$0xff] %v2196_v56  ;;  %920 = vperm.xlu1 %1664, %v2194_v28   ;;  %v2200_v25 = vpop.permute.xlu0 %1084  ;;  %v235_v56 = vlaneseq }
 0x11f   : > { %2868 = vst [vmem:[#allocation36_spill] sm:$0xff] %v2200_v25 }
 0x121   : > { %1687 = vset.pattern.permute.xlu0 %v2869_v3 }
 0x122   : > { %1666 = vset.pattern.permute.xlu1 %v2870_v16  ;;  %v2204_v54 = vpop.permute.xlu1 %580  ;;  %684 = vperm.xlu0 %1687, %v1868_v12   ;;  %v2874_v16 = vmov 1  }
 0x123   : > { %2871 = vst [vmem:[#allocation37_spill] sm:$0xff] %v2204_v54  ;;  %932 = vperm.xlu1 %1666, %v1943_v37   ;;  %v2208_v35 = vpop.permute.xlu0 %456 }
 0x124   : > { %2872 = vst [vmem:[#allocation38_spill] sm:$0xff] %v2208_v35  ;;  %v2231_v35 = vshrl.u32 %v235_v56, 7 }
 0x126   : > { %v2210_v0 = vpop.permute.xlu1 %584  ;;  %704 = vperm.xlu0 %1687, %v1876_v14  }
 0x127   : > { %2873 = vst [vmem:[#allocation39_spill] sm:$0xff] %v2210_v0  ;;  %936 = vperm.xlu1 %1666, %v1902_v26   ;;  %v2214_v25 = vpop.permute.xlu0 %476 }
 0x12a   : > { %712 = vperm.xlu0 %1687, %v1887_v17  }
 0x12b   : > { %1668 = vset.pattern.permute.xlu1 %v2874_v16  ;;  %v2219_v3 = vpop.permute.xlu1 %604  ;;  %v2221_v54 = vpop.permute.xlu0 %484 }
 0x12c   : > { %2875 = vst [vmem:[#allocation40_spill] sm:$0xff] %v2219_v3  ;;  %956 = vperm.xlu1 %1668, %v1898_v24  }
 0x12e   : > { %1320 = vperm.xlu0 %1687, %v1943_v37  }
 0x12f   : > { %v2226_v0 = vpop.permute.xlu1 %612  ;;  %v2228_v4 = vpop.permute.xlu0 %1104 }
 0x130   : > { %2876 = vst [vmem:[#allocation41_spill] sm:$0xff] %v2226_v0  ;;  %2877 = vst [vmem:[#allocation42_spill] sm:$0xff] %v2228_v4  ;;  %964 = vperm.xlu1 %1668, %v1902_v26   ;;  %v237_v0 = vsub.s32 0, %v2231_v35  ;;  %v2243_v4 = vld [vmem:[%s165_s7] sm:$0xff]  ;;  %s1697_s7 = scalar_lea.vmem %s2761_s29, 32 }
 0x131   : > { %p1698_p11 = scmp.ne.s32.totalorder %s2761_s29, %s1697_s7  ;;  %p1705_p1 = scmp.lt.s32.totalorder %s1703_s9, %s1697_s7 }
 0x132   : > { %1336 = vperm.xlu0 %1687, %v1907_v27   ;;  %v2252_v30 = vrot.slane %v2243_v4, %v237_v0 }
 0x133   : > { %v2237_v16 = vpop.permute.xlu1 %616  ;;  %v2239_v3 = vpop.permute.xlu0 %1120  ;;  %p1699_p12 = pnand %p1698_p11, %p1836_p5  ;;  %p1706_p2 = por %p1705_p1, %p1704_p0 }
 0x134   : > { %2878 = vst [vmem:[#allocation43_spill] sm:$0xff] %v2237_v16  ;;  %2879 = vst [vmem:[#allocation44_spill] sm:$0xff] %v2239_v3  ;;  %968 = vperm.xlu1 %1668, %v1927_v32   ;;  %v317_v16 = vsub.s32 1, %v2231_v35  ;;  %v2882_v3 = vmov 14   ;;  %v289_v53 = vmul.f32 %v2017_v55, %v2252_v30  ;;  %v241_v55 = vmul.f32 %v2252_v30, %v1982_v42 }
 0x135   : > { %v469_v42 = vsub.s32 3, %v2231_v35  ;;  %p1700_p13 = pneg %p1699_p12 }
 0x136   : > { %1344 = vperm.xlu0 %1687, %v1913_v29   ;;  %v2267_v6 = vrot.slane %v2243_v4, %v317_v16  ;;  %v269_v63 = vadd.f32 %v2004_v50, %v241_v55  ;;  %v545_v55 = vsub.s32 4, %v2231_v35 }
 0x137   : > { %v2246_v56 = vpop.permute.xlu1 %632  ;;  %v2248_v40 = vpop.permute.xlu0 %1128  ;;  %p1707_p3 = pnand %p1706_p2, %p1700_p13 }
 0x138   : > { %2880 = vst [vmem:[#allocation45_spill] sm:$0xff] %v2246_v56  ;;  %2881 = vst [vmem:[#allocation46_spill] sm:$0xff] %v2248_v40  ;;  %980 = vperm.xlu1 %1668, %v2185_v7   ;;  %v239_v56 = vmul.f32 %v2252_v30, %v1984_v43  ;;  %v287_v40 = vmul.f32 %v2040_v62, %v2252_v30 }
 0x13a   : > { %1689 = vset.pattern.permute.xlu0 %v2882_v3  ;;  %v393_v3 = vsub.s32 2, %v2231_v35  ;;  %v267_v43 = vadd.f32 %v1996_v47, %v239_v56  ;;  %v291_v62 = vsub.f32 1.0, %v287_v40  ;;  %v363_v40 = vmul.f32 %v2106_v38, %v2267_v6 }
 0x13b   : > { %v2258_v23 = vpop.permute.xlu1 %640  ;;  %728 = vperm.xlu0 %1689, %v1862_v10   ;;  %v321_v10 = vmul.f32 %v2267_v6, %v2029_v59 }
 0x13c   : > { %2883 = vst [vmem:[#allocation47_spill] sm:$0xff] %v2258_v23  ;;  %988 = vperm.xlu1 %1668, %v2194_v28   ;;  %v501_v0 = vpop.permute.xlu0 %500  ;;  %v293_v23 = vsub.f32 1.0, %v289_v53  ;;  %v319_v53 = vmul.f32 %v2267_v6, %v2023_v57  ;;  %v2288_v47 = vrot.slane %v2243_v4, %v393_v3  ;;  %v2301_v3 = vrot.slane %v2243_v4, %v469_v42 }
 0x13d   : > { %v341_v46 = vadd.f32 %v2079_v21, %v321_v10  ;;  %v295_v10 = vmul.f32 %v291_v62, %v267_v43 }
 0x13e   : > { %v297_v59 = vmul.f32 %v293_v23, %v269_v63  ;;  %v339_v50 = vadd.f32 %v2073_v19, %v319_v53  ;;  %v395_v23 = vmul.f32 %v2288_v47, %v2069_v18  ;;  %v397_v38 = vmul.f32 %v2288_v47, %v2075_v20 }
 0x13f   : > { %740 = vperm.xlu0 %1689, %v1866_v11   ;;  %v367_v63 = vsub.f32 1.0, %v363_v40  ;;  %v441_v18 = vmul.f32 %v2108_v34, %v2288_v47  ;;  %v2885_v53 = vmov 2   ;;  %v473_v34 = vmul.f32 %v2301_v3, %v2120_v39 }
 0x140   : > { %1670 = vset.pattern.permute.xlu1 %v2884_v5  ;;  %v2277_v29 = vpop.permute.xlu1 %656  ;;  %v2279_v16 = vpop.permute.xlu0 %512  ;;  %v365_v5 = vmul.f32 %v2062_v8, %v2267_v6  ;;  %v345_v57 = vmul.f32 %v341_v46, %v297_v59  ;;  %v439_v8 = vmul.f32 %v2176_v58, %v2288_v47  ;;  %v343_v46 = vmul.f32 %v339_v50, %v295_v10 }
 0x141   : > { %1004 = vperm.xlu1 %1670, %v1943_v37   ;;  %v415_v43 = vadd.f32 %v2141_v13, %v395_v23  ;;  %v417_v62 = vadd.f32 %v2150_v48, %v397_v38  ;;  %v471_v59 = vmul.f32 %v2301_v3, %v2114_v31  ;;  %v515_v10 = vmul.f32 %v501_v0, %v2301_v3 }
 0x142   : > { %v369_v19 = vsub.f32 1.0, %v365_v5  ;;  %v371_v58 = vmul.f32 %v367_v63, %v343_v46  ;;  %v443_v5 = vsub.f32 1.0, %v439_v8  ;;  %v2326_v48 = vrot.slane %v2243_v4, %v545_v55 }
 0x143   : > { %1360 = vperm.xlu0 %1689, %v1898_v24   ;;  %v2887_v13 = vmov 7   ;;  %v491_v23 = vadd.f32 %v2214_v25, %v471_v59  ;;  %v445_v0 = vsub.f32 1.0, %v441_v18  ;;  %v493_v8 = vadd.f32 %v2221_v54, %v473_v34 }
 0x144   : > { %v2296_v21 = vpop.permute.xlu1 %660  ;;  %v2298_v56 = vpop.permute.xlu0 %1144  ;;  %v373_v20 = vmul.f32 %v369_v19, %v345_v57  ;;  %2886 = vst [vmem:[#allocation48_spill] sm:$0xff] %v2326_v48  ;;  %v419_v50 = vmul.f32 %v415_v43, %v371_v58  ;;  %v519_v19 = vsub.f32 1.0, %v515_v10  ;;  %v290_v39 = vmul.f32 %v2047_v1, %v2252_v30 }
 0x145   : > { %1008 = vperm.xlu1 %1670, %v1902_v26   ;;  %v517_v55 = vmul.f32 %v2161_v9, %v2301_v3  ;;  %v242_v1 = vmul.f32 %v2252_v30, %v1988_v44  ;;  %v366_v59 = vmul.f32 %v2112_v33, %v2267_v6  ;;  %v322_v44 = vmul.f32 %v2267_v6, %v2035_v61 }
 0x146   : > { %v421_v57 = vmul.f32 %v417_v62, %v373_v20  ;;  %v447_v63 = vmul.f32 %v443_v5, %v419_v50  ;;  %v442_v61 = vmul.f32 %v2182_v41, %v2288_v47 }
 0x147   : > { %1372 = vperm.xlu0 %1689, %v1927_v32   ;;  %v521_v9 = vsub.f32 1.0, %v517_v55 }
 0x148   : > { %v2314_v42 = vpop.permute.xlu0 %1156  ;;  %v495_v25 = vmul.f32 %v491_v23, %v447_v63  ;;  %v449_v46 = vmul.f32 %v445_v0, %v421_v57  ;;  %v288_v0 = vmul.f32 %v2010_v52, %v2252_v30 }
 0x149   : > { %1672 = vset.pattern.permute.xlu1 %v2885_v53  ;;  %v2319_v40 = vpop.permute.xlu1 %680  ;;  %v294_v53 = vsub.f32 1.0, %v290_v39 }
 0x14a   : > { %1028 = vperm.xlu1 %1672, %v1898_v24   ;;  %v497_v54 = vmul.f32 %v493_v8, %v449_v46  ;;  %v523_v18 = vmul.f32 %v519_v19, %v495_v25  ;;  %v240_v8 = vmul.f32 %v2252_v30, %v1990_v45  ;;  %v398_v19 = vmul.f32 %v2288_v47, %v2081_v22  ;;  %v2891_v45 = vld [vmem:[#allocation7_spill] sm:$0xff] }
 0x14b   : > { %1691 = vset.pattern.permute.xlu0 %v2887_v13  ;;  %v292_v52 = vsub.f32 1.0, %v288_v0  ;;  %v446_v46 = vsub.f32 1.0, %v442_v61 }
 0x14c   : > { %760 = vperm.xlu0 %1691, %v1868_v12   ;;  %v547_v12 = vmul.f32 %v2326_v48, %v2167_v60  ;;  %v549_v60 = vmul.f32 %v2326_v48, %v2172_v51  ;;  %v525_v34 = vmul.f32 %v521_v9, %v497_v54  ;;  %v418_v41 = vadd.f32 %v2094_v36, %v398_v19  ;;  %v2893_v54 = vld [vmem:[#allocation6_spill] sm:$0xff]  ;;  %v2896_v36 = vld [vmem:[#allocation25_spill] sm:$0xff] }
 0x14d   : > { %v2333_v31 = vpop.permute.xlu1 %688  ;;  %v2335_v38 = vpop.permute.xlu0 %532 }
 0x14e   : > { %1036 = vperm.xlu1 %1672, %v1902_v26  }
 0x150   : > { %780 = vperm.xlu0 %1691, %v1876_v14   ;;  %v270_v14 = vadd.f32 %v2002_v49, %v242_v1  ;;  %v370_v49 = vsub.f32 1.0, %v366_v59  ;;  %v2897_v59 = vld [vmem:[#allocation24_spill] sm:$0xff] }
 0x151   : > { %v2346_v43 = vpop.permute.xlu1 %692  ;;  %v553_v62 = vpop.permute.xlu0 %552 }
 0x152   : > { %v567_v20 = vadd.f32 %v553_v62, %v547_v12  ;;  %1040 = vperm.xlu1 %1672, %v1927_v32   ;;  %v298_v51 = vmul.f32 %v294_v53, %v270_v14  ;;  %v2890_v12 = vmov 10   ;;  %v2892_v62 = vld [vmem:[#allocation13_spill] sm:$0xff]  ;;  %v2895_v53 = vld [vmem:[#allocation15_spill] sm:$0xff] }
 0x153   : > { %v364_v9 = vmul.f32 %v2895_v53, %v2267_v6  ;;  %v2906_v53 = vld [vmem:[#allocation35_spill] sm:$0xff] }
 0x154   : > { %v2353_v58 = vmul.f32 %v567_v20, %v523_v18  ;;  %788 = vperm.xlu0 %1691, %v1887_v17   ;;  %v342_v17 = vadd.f32 %v2049_v2, %v322_v44  ;;  %v320_v2 = vmul.f32 %v2267_v6, %v2067_v15  ;;  %v268_v15 = vadd.f32 %v2891_v45, %v240_v8  ;;  %v2904_v45 = vld [vmem:[#allocation38_spill] sm:$0xff] }
 0x155   : > { %v2359_v5 = vpop.permute.xlu1 %708  ;;  %v561_v10 = vpop.permute.xlu0 %560  ;;  %v518_v18 = vmul.f32 %v2279_v16, %v2301_v3  ;;  %v2898_v44 = vmov 15   ;;  %v2899_v16 = vld [vmem:[#allocation27_spill] sm:$0xff]  ;;  %v368_v0 = vsub.f32 1.0, %v364_v9 }
 0x156   : > { %v569_v50 = vadd.f32 %v561_v10, %v549_v60  ;;  %1052 = vperm.xlu1 %1672, %v2185_v7   ;;  %v346_v63 = vmul.f32 %v342_v17, %v298_v51  ;;  %v296_v1 = vmul.f32 %v292_v52, %v268_v15  ;;  %v396_v60 = vmul.f32 %v2288_v47, %v2896_v36 }
 0x157   : > { %v474_v10 = vmul.f32 %v2301_v3, %v2897_v59  ;;  %v522_v17 = vsub.f32 1.0, %v518_v18  ;;  %v472_v15 = vmul.f32 %v2301_v3, %v2904_v45 }
 0x158   : > { %v2364_v57 = vmul.f32 %v569_v50, %v525_v34  ;;  %1392 = vperm.xlu0 %1691, %v1943_v37   ;;  %v374_v39 = vmul.f32 %v370_v49, %v346_v63  ;;  %v2900_v49 = vld [vmem:[#allocation5_spill] sm:$0xff]  ;;  %v2901_v63 = vld [vmem:[#allocation18_spill] sm:$0xff] }
 0x159   : > { %v2368_v23 = vpop.permute.xlu1 %716  ;;  %v2370_v33 = vpop.permute.xlu0 %1176  ;;  %v494_v51 = vadd.f32 %v2899_v16, %v474_v10  ;;  %v416_v61 = vadd.f32 %v2901_v63, %v396_v60 }
 0x15a   : > { %2888 = vst [vmem:[#allocation49_spill] sm:$0xff] %v2370_v33  ;;  %1060 = vperm.xlu1 %1672, %v2194_v28   ;;  %v422_v22 = vmul.f32 %v418_v41, %v374_v39  ;;  %v2902_v39 = vmov 3  }
 0x15c   : > { %1408 = vperm.xlu0 %1691, %v1907_v27   ;;  %v340_v27 = vadd.f32 %v2892_v62, %v320_v2  ;;  %v450_v34 = vmul.f32 %v446_v46, %v422_v22  ;;  %v2905_v62 = vld [vmem:[#allocation32_spill] sm:$0xff] }
 0x15d   : > { %v2384_v55 = vpop.permute.xlu0 %1192 }
 0x15e   : > { %2889 = vst [vmem:[#allocation50_spill] sm:$0xff] %v2384_v55  ;;  %1674 = vset.pattern.permute.xlu1 %v2890_v12  ;;  %v2387_v25 = vpop.permute.xlu1 %732  ;;  %v344_v50 = vmul.f32 %v340_v27, %v296_v1  ;;  %v498_v2 = vmul.f32 %v494_v51, %v450_v34  ;;  %v2903_v12 = vld [vmem:[#allocation21_spill] sm:$0xff]  ;;  %v550_v27 = vmul.f32 %v2326_v48, %v2905_v62  ;;  %v2907_v34 = vld [vmem:[#allocation26_spill] sm:$0xff]  ;;  %v2913_v62 = vmov 0  }
 0x15f   : > { %1076 = vperm.xlu1 %1674, %v1943_v37   ;;  %v440_v41 = vmul.f32 %v2903_v12, %v2288_v47 }
 0x160   : > { %1416 = vperm.xlu0 %1691, %v2893_v54   ;;  %v372_v46 = vmul.f32 %v368_v0, %v344_v50  ;;  %v526_v54 = vmul.f32 %v522_v17, %v498_v2  ;;  %v570_v9 = vadd.f32 %v2906_v53, %v550_v27  ;;  %v492_v50 = vadd.f32 %v2907_v34, %v472_v15  ;;  %v2915_v34 = vld [vmem:[#allocation39_spill] sm:$0xff] }
 0x161   : > { %v2396_v20 = vpop.permute.xlu0 %1200  ;;  %v444_v10 = vsub.f32 1.0, %v440_v41 }
 0x162   : > { %2894 = vst [vmem:[#allocation7_spill] sm:$0xff] %v2396_v20  ;;  %v2402_v14 = vpop.permute.xlu1 %736  ;;  %v420_v18 = vmul.f32 %v416_v61, %v372_v46  ;;  %v574_v16 = vmul.f32 %v570_v9, %v526_v54 }
 0x163   : > { %1080 = vperm.xlu1 %1674, %v1902_v26  }
 0x164   : > { %1693 = vset.pattern.permute.xlu0 %v2898_v44 }
 0x165   : > { %804 = vperm.xlu0 %1693, %v2900_v49   ;;  %v448_v49 = vmul.f32 %v444_v10, %v420_v18 }
 0x166   : > { %v577_v8 = vpop.permute.xlu0 %576 }
 0x167   : > { %v591_v19 = vmul.f32 %v577_v8, %v2326_v48  ;;  %1676 = vset.pattern.permute.xlu1 %v2902_v39  ;;  %v2413_v52 = vpop.permute.xlu1 %756  ;;  %v496_v8 = vmul.f32 %v492_v50, %v448_v49  ;;  %v2910_v39 = vld [vmem:[#allocation33_spill] sm:$0xff]  ;;  %v593_v50 = vmul.f32 %v2915_v34, %v2326_v48 }
 0x168   : > { %1100 = vperm.xlu1 %1676, %v1898_v24  }
 0x169   : > { %v595_v22 = vsub.f32 1.0, %v591_v19  ;;  %816 = vperm.xlu0 %1693, %v1866_v11   ;;  %v2908_v11 = vld [vmem:[#allocation28_spill] sm:$0xff]  ;;  %v621_v19 = vsub.s32 5, %v2231_v35 }
 0x16a   : > { %v589_v1 = vpop.permute.xlu0 %588  ;;  %v516_v17 = vmul.f32 %v2908_v11, %v2301_v3 }
 0x16b   : > { %v599_v36 = vmul.f32 %v595_v22, %v2353_v58  ;;  %v594_v60 = vmul.f32 %v589_v1, %v2326_v48  ;;  %v2426_v59 = vpop.permute.xlu1 %764  ;;  %v548_v58 = vmul.f32 %v2326_v48, %v2335_v38  ;;  %v2912_v38 = vld [vmem:[#allocation37_spill] sm:$0xff]  ;;  %v2454_v27 = vrot.slane %v2243_v4, %v621_v19 }
 0x16c   : > { %1108 = vperm.xlu1 %1676, %v1902_v26   ;;  %v520_v2 = vsub.f32 1.0, %v516_v17  ;;  %v592_v45 = vmul.f32 %v2912_v38, %v2326_v48  ;;  %v196_v22 = vld [vmem:[%s2803_s2 + $0x28] sm:$0xff]  ;;  %v2918_v19 = vmov 11  }
 0x16d   : > { %v598_v51 = vsub.f32 1.0, %v594_v60  ;;  %1432 = vperm.xlu0 %1693, %v1898_v24   ;;  %v568_v12 = vadd.f32 %v2910_v39, %v548_v58  ;;  %2914 = vst [vmem:[#allocation15_spill] sm:$0xff] %v2454_v27  ;;  %v204_v53 = vmax.f32 %v196_v22, 0.0  ;;  %v2917_v17 = vld [vmem:[#allocation45_spill] sm:$0xff] }
 0x16e   : > { %v2435_v0 = vpop.permute.xlu0 %1216  ;;  %v524_v15 = vmul.f32 %v520_v2, %v496_v8  ;;  %v596_v9 = vsub.f32 1.0, %v592_v45  ;;  %v2919_v38 = vld [vmem:[#allocation41_spill] sm:$0xff] }
 0x16f   : > { %2909 = vst [vmem:[#allocation13_spill] sm:$0xff] %v2435_v0  ;;  %v2437_v63 = vmul.f32 %v598_v51, %v574_v16  ;;  %v2439_v61 = vpop.permute.xlu1 %768  ;;  %v212_v10 = vmin.f32 %v204_v53, 1.0  ;;  %v2916_v16 = vld [vmem:[#allocation40_spill] sm:$0xff]  ;;  %v625_v45 = vmul.f32 %v2454_v27, %v2919_v38  ;;  %v2937_v0 = vld [vmem:[#allocation10_spill] sm:$0xff] }
 0x170   : > { %1112 = vperm.xlu1 %1676, %v1927_v32   ;;  %v572_v54 = vmul.f32 %v568_v12, %v524_v15  ;;  %v623_v51 = vmul.f32 %v2454_v27, %v2916_v16  ;;  %v597_v12 = vsub.f32 1.0, %v593_v50 }
 0x171   : > { %1444 = vperm.xlu0 %1693, %v1927_v32  }
 0x172   : > { %v2445_v41 = vpop.permute.xlu0 %1228  ;;  %v600_v11 = vmul.f32 %v596_v9, %v572_v54  ;;  %v601_v54 = vmul.f32 %v597_v12, %v2364_v57  ;;  %v2925_v12 = vld [vmem:[#allocation47_spill] sm:$0xff] }
 0x173   : > { %2911 = vst [vmem:[#allocation6_spill] sm:$0xff] %v2445_v41  ;;  %v2447_v46 = vpop.permute.xlu1 %784 }
 0x174   : > { %1124 = vperm.xlu1 %1676, %v2185_v7  }
 0x175   : > { %1696 = vset.pattern.permute.xlu0 %v2913_v62 }
 0x176   : > { %1466 = vperm.xlu0 %1696, %v212_v10   ;;  %v2921_v10 = vmov 4  }
 0x177   : > { %v2459_v18 = vpop.permute.xlu1 %792  ;;  %v609_v1 = vpop.permute.xlu0 %608 }
 0x178   : > { %v624_v60 = vmul.f32 %v2454_v27, %v609_v1  ;;  %1132 = vperm.xlu1 %1676, %v2194_v28  }
 0x17a   : > { %v644_v49 = vadd.f32 %v2917_v17, %v624_v60 }
 0x17b   : > { %v629_v58 = vpop.permute.xlu0 %628 }
 0x17c   : > { %v648_v8 = vmul.f32 %v644_v49, %v600_v11  ;;  %v643_v2 = vadd.f32 %v629_v58, %v623_v51  ;;  %1678 = vset.pattern.permute.xlu1 %v2918_v19  ;;  %v2469_v39 = vpop.permute.xlu1 %808  ;;  %v2924_v49 = vld [vmem:[#allocation43_spill] sm:$0xff] }
 0x17d   : > { %1148 = vperm.xlu1 %1678, %v1943_v37   ;;  %v626_v58 = vmul.f32 %v2454_v27, %v2924_v49  ;;  %v2927_v49 = vmov 12  }
 0x17e   : > { %v647_v15 = vmul.f32 %v643_v2, %v599_v36 }
 0x17f   : > { %v637_v22 = vpop.permute.xlu0 %636  ;;  %v646_v38 = vadd.f32 %v2925_v12, %v626_v58 }
 0x180   : > { %v645_v1 = vadd.f32 %v637_v22, %v625_v45  ;;  %v2475_v53 = vpop.permute.xlu1 %812 }
 0x181   : > { %1152 = vperm.xlu1 %1678, %v1902_v26  }
 0x182   : > { %v649_v9 = vmul.f32 %v645_v1, %v601_v54  ;;  %v650_v1 = vmul.f32 %v646_v38, %v2437_v63 }
 0x183   : > { %v2478_v60 = vpop.permute.xlu0 %1248 }
 0x184   : > { %2920 = vst [vmem:[#allocation25_spill] sm:$0xff] %v2478_v60 }
 0x185   : > { %1680 = vset.pattern.permute.xlu1 %v2921_v10  ;;  %v2481_v34 = vpop.permute.xlu1 %833 }
 0x186   : > { %1172 = vperm.xlu1 %1680, %v1898_v24  }
 0x187   : > { %v2484_v50 = vpop.permute.xlu0 %1264 }
 0x188   : > { %2922 = vst [vmem:[#allocation24_spill] sm:$0xff] %v2484_v50 }
 0x189   : > { %v2486_v36 = vpop.permute.xlu1 %843 }
 0x18a   : > { %1180 = vperm.xlu1 %1680, %v1902_v26  }
 0x18b   : > { %v2489_v57 = vpop.permute.xlu0 %1272 }
 0x18c   : > { %2923 = vst [vmem:[#allocation27_spill] sm:$0xff] %v2489_v57 }
 0x18d   : > { %v2491_v16 = vpop.permute.xlu1 %848 }
 0x18e   : > { %1184 = vperm.xlu1 %1680, %v1927_v32  }
 0x190   : > { %v653_v51 = vpop.permute.xlu0 %652 }
 0x191   : > { %v667_v11 = vmul.f32 %v653_v51, %v2454_v27  ;;  %v883_v17 = vpop.permute.xlu1 %882 }
 0x192   : > { %1196 = vperm.xlu1 %1680, %v2185_v7  }
 0x193   : > { %v671_v2 = vsub.f32 1.0, %v667_v11 }
 0x194   : > { %v665_v19 = vpop.permute.xlu0 %664 }
 0x195   : > { %v675_v45 = vmul.f32 %v671_v2, %v647_v15  ;;  %v670_v22 = vmul.f32 %v665_v19, %v2454_v27  ;;  %v2500_v54 = vpop.permute.xlu1 %892  ;;  %v697_v15 = vsub.s32 6, %v2231_v35  ;;  %v668_v2 = vmul.f32 %v2277_v29, %v2454_v27 }
 0x196   : > { %1204 = vperm.xlu1 %1680, %v2194_v28  }
 0x197   : > { %v674_v10 = vsub.f32 1.0, %v670_v22  ;;  %v2519_v63 = vrot.slane %v2243_v4, %v697_v15  ;;  %v672_v12 = vsub.f32 1.0, %v668_v2 }
 0x198   : > { %v2504_v51 = vpop.permute.xlu0 %1288 }
 0x199   : > { %2926 = vst [vmem:[#allocation5_spill] sm:$0xff] %v2504_v51  ;;  %v2506_v60 = vmul.f32 %v674_v10, %v650_v1  ;;  %v911_v57 = vpop.permute.xlu1 %910  ;;  %v2929_v1 = vmov 5   ;;  %v669_v10 = vmul.f32 %v2296_v21, %v2454_v27  ;;  %v2935_v27 = vmov 6  }
 0x19a   : > { %1682 = vset.pattern.permute.xlu1 %v2927_v49  ;;  %v699_v49 = vmul.f32 %v2519_v63, %v2319_v40 }
 0x19b   : > { %1220 = vperm.xlu1 %1682, %v1943_v37  }
 0x19c   : > { %v2511_v11 = vpop.permute.xlu0 %1300 }
 0x19d   : > { %2928 = vst [vmem:[#allocation18_spill] sm:$0xff] %v2511_v11  ;;  %v2513_v58 = vpop.permute.xlu1 %920  ;;  %v676_v11 = vmul.f32 %v672_v12, %v648_v8 }
 0x19f   : > { %1224 = vperm.xlu1 %1682, %v1902_v26  }
 0x1a1   : > { %v685_v19 = vpop.permute.xlu0 %684 }
 0x1a2   : > { %v700_v38 = vmul.f32 %v2519_v63, %v685_v19  ;;  %v933_v22 = vpop.permute.xlu1 %932  ;;  %v673_v19 = vsub.f32 1.0, %v669_v10 }
 0x1a3   : > { %1684 = vset.pattern.permute.xlu1 %v2929_v1  ;;  %v701_v1 = vmul.f32 %v2519_v63, %v2333_v31 }
 0x1a4   : > { %v720_v29 = vadd.f32 %v2359_v5, %v700_v38  ;;  %1244 = vperm.xlu1 %1684, %v1898_v24   ;;  %v677_v40 = vmul.f32 %v673_v19, %v649_v9  ;;  %v2934_v19 = vld [vmem:[#allocation17_spill] sm:$0xff] }
 0x1a5   : > { %v705_v15 = vpop.permute.xlu0 %704 }
 0x1a6   : > { %v2529_v50 = vmul.f32 %v720_v29, %v676_v11  ;;  %v719_v2 = vadd.f32 %v705_v15, %v699_v49  ;;  %v937_v51 = vpop.permute.xlu1 %936  ;;  %v2933_v49 = vmov 13   ;;  %v944_v29 = vmul.f32 %v933_v22, %v2252_v30 }
 0x1a8   : > { %v2533_v41 = vmul.f32 %v719_v2, %v675_v45  ;;  %1252 = vperm.xlu1 %1684, %v1902_v26  }
 0x1a9   : > { %v713_v21 = vpop.permute.xlu0 %712 }
 0x1aa   : > { %v721_v8 = vadd.f32 %v713_v21, %v701_v1  ;;  %v972_v1 = vmul.f32 %v2934_v19, %v2267_v6  ;;  %v896_v21 = vmul.f32 %v883_v17, %v2252_v30  ;;  %v945_v17 = vmul.f32 %v937_v51, %v2252_v30 }
 0x1ab   : > { %v2536_v12 = vpop.permute.xlu1 %956 }
 0x1ac   : > { %v2538_v5 = vmul.f32 %v721_v8, %v677_v40  ;;  %1256 = vperm.xlu1 %1684, %v1927_v32   ;;  %v948_v40 = vsub.f32 1.0, %v944_v29 }
 0x1ad   : > { %v2541_v11 = vpop.permute.xlu0 %1320 }
 0x1ae   : > { %2930 = vst [vmem:[#allocation21_spill] sm:$0xff] %v2541_v11 }
 0x1af   : > { %v965_v38 = vpop.permute.xlu1 %964 }
 0x1b0   : > { %1268 = vperm.xlu1 %1684, %v2185_v7  }
 0x1b1   : > { %v2544_v10 = vpop.permute.xlu0 %1336 }
 0x1b2   : > { %2931 = vst [vmem:[#allocation38_spill] sm:$0xff] %v2544_v10 }
 0x1b3   : > { %v969_v31 = vpop.permute.xlu1 %968 }
 0x1b4   : > { %1276 = vperm.xlu1 %1684, %v2194_v28  }
 0x1b5   : > { %v2547_v45 = vpop.permute.xlu0 %1344 }
 0x1b6   : > { %2932 = vst [vmem:[#allocation32_spill] sm:$0xff] %v2547_v45  ;;  %v924_v45 = vadd.f32 %v911_v57, %v896_v21  ;;  %v897_v57 = vmul.f32 %v2937_v0, %v2252_v30 }
 0x1b7   : > { %v981_v9 = vpop.permute.xlu1 %980 }
 0x1b8   : > { %1686 = vset.pattern.permute.xlu1 %v2933_v49  ;;  %v992_v11 = vadd.f32 %v981_v9, %v972_v1  ;;  %v952_v10 = vmul.f32 %v948_v40, %v924_v45  ;;  %v973_v9 = vmul.f32 %v965_v38, %v2267_v6  ;;  %v2939_v40 = vld [vmem:[#allocation12_spill] sm:$0xff] }
 0x1b9   : > { %1292 = vperm.xlu1 %1686, %v1943_v37   ;;  %v2941_v38 = vld [vmem:[#allocation16_spill] sm:$0xff] }
 0x1ba   : > { %v2552_v15 = vpop.permute.xlu0 %728  ;;  %v996_v19 = vmul.f32 %v992_v11, %v952_v10  ;;  %v925_v11 = vadd.f32 %v2939_v40, %v897_v57  ;;  %v2940_v10 = vld [vmem:[#allocation20_spill] sm:$0xff]  ;;  %v974_v40 = vmul.f32 %v969_v31, %v2267_v6  ;;  %v773_v31 = vsub.s32 7, %v2231_v35 }
 0x1bb   : > { %v989_v2 = vpop.permute.xlu1 %988 }
 0x1bd   : > { %1296 = vperm.xlu1 %1686, %v1902_v26  }
 0x1be   : > { %v2558_v8 = vpop.permute.xlu0 %740 }
 0x1c0   : > { %v1005_v49 = vpop.permute.xlu1 %1004 }
 0x1c1   : > { %v1016_v22 = vmul.f32 %v1005_v49, %v2267_v6  ;;  %1688 = vset.pattern.permute.xlu1 %v2935_v27  ;;  %v949_v27 = vsub.f32 1.0, %v945_v17  ;;  %v993_v49 = vadd.f32 %v2940_v10, %v973_v9 }
 0x1c2   : > { %1316 = vperm.xlu1 %1688, %v1898_v24   ;;  %v2563_v33 = vpop.permute.xlu0 %1360 }
 0x1c3   : > { %2936 = vst [vmem:[#allocation35_spill] sm:$0xff] %v2563_v33  ;;  %v1020_v20 = vsub.f32 1.0, %v1016_v22  ;;  %v953_v51 = vmul.f32 %v949_v27, %v925_v11 }
 0x1c4   : > { %v1009_v29 = vpop.permute.xlu1 %1008 }
 0x1c5   : > { %v1024_v55 = vmul.f32 %v1020_v20, %v996_v19  ;;  %v1017_v1 = vmul.f32 %v1009_v29, %v2267_v6  ;;  %v946_v19 = vmul.f32 %v2941_v38, %v2252_v30  ;;  %v997_v17 = vmul.f32 %v993_v49, %v953_v51  ;;  %v2943_v49 = vld [vmem:[#allocation23_spill] sm:$0xff] }
 0x1c6   : > { %1324 = vperm.xlu1 %1688, %v1902_v26   ;;  %v2570_v45 = vpop.permute.xlu0 %1372  ;;  %v994_v38 = vadd.f32 %v989_v2, %v974_v40  ;;  %v1018_v51 = vmul.f32 %v2943_v49, %v2267_v6  ;;  %v2946_v2 = vld [vmem:[#allocation14_spill] sm:$0xff]  ;;  %v745_v49 = vmul.f32 %v2402_v14, %v2519_v63  ;;  %v2950_v14 = vld [vmem:[#allocation19_spill] sm:$0xff] }
 0x1c7   : > { %2938 = vst [vmem:[#allocation26_spill] sm:$0xff] %v2570_v45  ;;  %v1021_v22 = vsub.f32 1.0, %v1017_v1  ;;  %v898_v45 = vmul.f32 %v2500_v54, %v2252_v30  ;;  %v2942_v1 = vld [vmem:[#allocation31_spill] sm:$0xff]  ;;  %v950_v33 = vsub.f32 1.0, %v946_v19  ;;  %v943_v19 = vmul.f32 %v2946_v2, %v2252_v30 }
 0x1c9   : > { %v1029_v21 = vpop.permute.xlu1 %1028  ;;  %v926_v9 = vadd.f32 %v2513_v58, %v898_v45  ;;  %v1025_v27 = vmul.f32 %v1021_v22, %v997_v17  ;;  %v2945_v22 = vld [vmem:[#allocation9_spill] sm:$0xff] }
 0x1ca   : > { %1328 = vperm.xlu1 %1688, %v1927_v32   ;;  %v895_v17 = vmul.f32 %v2945_v22, %v2252_v30  ;;  %v2609_v30 = vrot.slane %v2243_v4, %v773_v31  ;;  %v744_v4 = vmul.f32 %v2387_v25, %v2519_v63  ;;  %v743_v31 = vmul.f32 %v2552_v15, %v2519_v63 }
 0x1cb   : > { %v761_v20 = vpop.permute.xlu0 %760  ;;  %v954_v58 = vmul.f32 %v950_v33, %v926_v9  ;;  %v971_v33 = vmul.f32 %v2536_v12, %v2267_v6  ;;  %v1043_v25 = vmul.f32 %v1029_v21, %v2288_v47  ;;  %v746_v15 = vmul.f32 %v2558_v8, %v2519_v63 }
 0x1cc   : > { %v777_v12 = vmul.f32 %v2609_v30, %v2426_v59  ;;  %v702_v59 = vmul.f32 %v2519_v63, %v2346_v43  ;;  %v775_v21 = vmul.f32 %v2609_v30, %v2413_v52 }
 0x1cd   : > { %v1037_v0 = vpop.permute.xlu1 %1036 }
 0x1ce   : > { %v1045_v29 = vmul.f32 %v1037_v0, %v2288_v47  ;;  %1340 = vperm.xlu1 %1688, %v2185_v7   ;;  %v2944_v0 = vld [vmem:[#allocation29_spill] sm:$0xff]  ;;  %v722_v43 = vadd.f32 %v2368_v23, %v702_v59 }
 0x1cf   : > { %v2582_v57 = vpop.permute.xlu0 %780  ;;  %v1044_v62 = vmul.f32 %v2944_v0, %v2288_v47 }
 0x1d0   : > { %v1065_v11 = vadd.f32 %v2942_v1, %v1045_v29  ;;  %v998_v29 = vmul.f32 %v994_v38, %v954_v58  ;;  %v2948_v38 = vld [vmem:[#allocation11_spill] sm:$0xff]  ;;  %v947_v58 = vsub.f32 1.0, %v943_v19  ;;  %v749_v19 = vsub.f32 1.0, %v745_v49 }
 0x1d1   : > { %v1041_v10 = vpop.permute.xlu1 %1040  ;;  %v923_v0 = vadd.f32 %v2948_v38, %v895_v17 }
 0x1d2   : > { %v2587_v48 = vmul.f32 %v1065_v11, %v1025_v27  ;;  %1348 = vperm.xlu1 %1688, %v2194_v28   ;;  %v2947_v27 = vmov 14   ;;  %v1022_v11 = vsub.f32 1.0, %v1018_v51  ;;  %v1046_v35 = vmul.f32 %v1041_v10, %v2288_v47  ;;  %v2949_v51 = vld [vmem:[#allocation22_spill] sm:$0xff] }
 0x1d3   : > { %v789_v54 = vpop.permute.xlu0 %788  ;;  %v1015_v2 = vmul.f32 %v2949_v51, %v2267_v6  ;;  %v991_v10 = vadd.f32 %v2950_v14, %v971_v33  ;;  %v776_v6 = vmul.f32 %v2609_v30, %v761_v20  ;;  %v750_v51 = vsub.f32 1.0, %v746_v15 }
 0x1d5   : > { %v1053_v45 = vpop.permute.xlu1 %1052  ;;  %v1019_v33 = vsub.f32 1.0, %v1015_v2  ;;  %v796_v8 = vadd.f32 %v2447_v46, %v776_v6  ;;  %v795_v2 = vadd.f32 %v2582_v57, %v775_v21  ;;  %v2952_v46 = vld [vmem:[#allocation34_spill] sm:$0xff] }
 0x1d6   : > { %v1064_v40 = vadd.f32 %v1053_v45, %v1044_v62  ;;  %1690 = vset.pattern.permute.xlu1 %v2947_v27  ;;  %v1026_v45 = vmul.f32 %v1022_v11, %v998_v29  ;;  %v797_v29 = vadd.f32 %v789_v54, %v777_v12  ;;  %v821_v27 = vmul.f32 %v2475_v53, %v2609_v30 }
 0x1d7   : > { %1364 = vperm.xlu1 %1690, %v1943_v37   ;;  %v2601_v1 = vpop.permute.xlu0 %1392  ;;  %v748_v54 = vsub.f32 1.0, %v744_v4  ;;  %v747_v53 = vsub.f32 1.0, %v743_v31  ;;  %v1087_v12 = vmul.f32 %v2952_v46, %v2288_v47 }
 0x1d8   : > { %v1068_v9 = vmul.f32 %v1064_v40, %v1024_v55  ;;  %v951_v40 = vmul.f32 %v947_v58, %v923_v0  ;;  %v820_v0 = vmul.f32 %v2469_v39, %v2609_v30  ;;  %v2951_v58 = vld [vmem:[#allocation30_spill] sm:$0xff]  ;;  %v726_v39 = vmul.f32 %v722_v43, %v2506_v60 }
 0x1d9   : > { %v1061_v62 = vpop.permute.xlu1 %1060  ;;  %v752_v23 = vmul.f32 %v748_v54, %v2529_v50  ;;  %v751_v4 = vmul.f32 %v747_v53, %v2533_v41 }
 0x1da   : > { %v1066_v22 = vadd.f32 %v1061_v62, %v1046_v35  ;;  %v753_v35 = vmul.f32 %v749_v19, %v2538_v5  ;;  %v995_v62 = vmul.f32 %v991_v10, %v951_v40  ;;  %v824_v6 = vsub.f32 1.0, %v820_v0 }
 0x1db   : > { %1368 = vperm.xlu1 %1690, %v1902_v26   ;;  %v2617_v55 = vpop.permute.xlu0 %1408  ;;  %v800_v50 = vmul.f32 %v796_v8, %v752_v23  ;;  %v754_v40 = vmul.f32 %v750_v51, %v726_v39  ;;  %v799_v59 = vmul.f32 %v795_v2, %v751_v4  ;;  %v2955_v23 = vld [vmem:[#allocation46_spill] sm:$0xff] }
 0x1dc   : > { %v2624_v17 = vmul.f32 %v1066_v22, %v1026_v45  ;;  %v801_v38 = vmul.f32 %v797_v29, %v753_v35  ;;  %v1063_v45 = vadd.f32 %v2951_v58, %v1043_v25  ;;  %v1023_v14 = vmul.f32 %v1019_v33, %v995_v62  ;;  %v2953_v62 = vld [vmem:[#allocation44_spill] sm:$0xff] }
 0x1dd   : > { %v1091_v25 = vsub.f32 1.0, %v1087_v12  ;;  %v2956_v12 = vld [vmem:[#allocation36_spill] sm:$0xff] }
 0x1de   : > { %v1077_v11 = vpop.permute.xlu1 %1076  ;;  %v1067_v29 = vmul.f32 %v1063_v45, %v1023_v14  ;;  %v1090_v4 = vmul.f32 %v2956_v12, %v2288_v47  ;;  %v2957_v14 = vld [vmem:[#allocation42_spill] sm:$0xff] }
 0x1df   : > { %v1088_v49 = vmul.f32 %v1077_v11, %v2288_v47  ;;  %1692 = vset.pattern.permute.xlu1 %v2887_v13  ;;  %v2637_v20 = vpop.permute.xlu0 %1416  ;;  %v825_v13 = vsub.f32 1.0, %v821_v27  ;;  %v1159_v11 = vmul.f32 %v2298_v56, %v2301_v3  ;;  %v2964_v12 = vld [vmem:[#allocation6_spill] sm:$0xff] }
 0x1e0   : > { %1388 = vperm.xlu1 %1692, %v1898_v24  }
 0x1e1   : > { %v1092_v5 = vsub.f32 1.0, %v1088_v49  ;;  %v829_v31 = vmul.f32 %v825_v13, %v801_v38 }
 0x1e2   : > { %v1081_v22 = vpop.permute.xlu1 %1080 }
 0x1e3   : > { %v2649_v24 = vmul.f32 %v1092_v5, %v1068_v9  ;;  %v1089_v52 = vmul.f32 %v1081_v22, %v2288_v47  ;;  %v778_v9 = vmul.f32 %v2609_v30, %v2439_v61  ;;  %v828_v61 = vmul.f32 %v824_v6, %v800_v50 }
 0x1e4   : > { %1396 = vperm.xlu1 %1692, %v1902_v26   ;;  %v805_v10 = vpop.permute.xlu0 %804  ;;  %v853_v49 = vmul.f32 %v2486_v36, %v829_v31 }
 0x1e5   : > { %v1093_v19 = vsub.f32 1.0, %v1089_v52  ;;  %v819_v57 = vmul.f32 %v805_v10, %v2609_v30  ;;  %v798_v33 = vadd.f32 %v2459_v18, %v778_v9  ;;  %v1163_v18 = vsub.f32 1.0, %v1159_v11 }
 0x1e6   : > { %v857_v36 = vsub.f32 1.0, %v853_v49  ;;  %v1116_v10 = vmul.f32 %v2957_v14, %v2301_v3 }
 0x1e7   : > { %v1097_v41 = vmul.f32 %v1093_v19, %v2587_v48  ;;  %v823_v27 = vsub.f32 1.0, %v819_v57  ;;  %v1101_v60 = vpop.permute.xlu1 %1100  ;;  %v1095_v48 = vmul.f32 %v1091_v25, %v1067_v29  ;;  %v802_v8 = vmul.f32 %v798_v33, %v754_v40  ;;  %v195_v19 = vld [vmem:[%s2803_s2 + $0x20] sm:$0xff] }
 0x1e8   : > { %v1115_v15 = vmul.f32 %v1101_v60, %v2301_v3  ;;  %1400 = vperm.xlu1 %1692, %v1927_v32   ;;  %v817_v35 = vpop.permute.xlu0 %816  ;;  %v2954_v32 = vld [vmem:[#allocation8_spill] sm:$0xff]  ;;  %v203_v29 = vmax.f32 %v195_v19, 0.0 }
 0x1e9   : > { %v827_v43 = vmul.f32 %v823_v27, %v799_v59  ;;  %v822_v54 = vmul.f32 %v817_v35, %v2609_v30  ;;  %v852_v13 = vmul.f32 %v2954_v32, %v828_v61  ;;  %v197_v59 = vld [vmem:[%s2803_s2 + $0x30] sm:$0xff] }
 0x1ea   : > { %v1135_v53 = vadd.f32 %v2953_v62, %v1115_v15  ;;  %v211_v60 = vmin.f32 %v203_v29, 1.0  ;;  %v205_v25 = vmax.f32 %v197_v59, 0.0  ;;  %v2958_v15 = vmov 0  }
 0x1eb   : > { %v851_v21 = vmul.f32 %v2481_v34, %v827_v43  ;;  %v826_v56 = vsub.f32 1.0, %v822_v54  ;;  %v1109_v38 = vpop.permute.xlu1 %1108  ;;  %v856_v39 = vsub.f32 1.0, %v852_v13 }
 0x1ec   : > { %v1139_v5 = vmul.f32 %v1135_v53, %v1095_v48  ;;  %v1117_v0 = vmul.f32 %v1109_v38, %v2301_v3  ;;  %1412 = vperm.xlu1 %1692, %v2185_v7   ;;  %v213_v35 = vmin.f32 %v205_v25, 1.0 }
 0x1ed   : > { %v855_v58 = vsub.f32 1.0, %v851_v21  ;;  %v830_v45 = vmul.f32 %v826_v56, %v802_v8  ;;  %v2959_v21 = vld [vmem:[#allocation48_spill] sm:$0xff]  ;;  %v2960_v8 = vld [vmem:[#allocation13_spill] sm:$0xff] }
 0x1ee   : > { %v1137_v22 = vadd.f32 %v2955_v23, %v1117_v0  ;;  %v1167_v51 = vmul.f32 %v1163_v18, %v1139_v5  ;;  %v1231_v56 = vmul.f32 %v2960_v8, %v2959_v21  ;;  %v2961_v18 = vld [vmem:[#allocation50_spill] sm:$0xff] }
 0x1ef   : > { %v859_v2 = vmul.f32 %v857_v36, %v855_v58  ;;  %v854_v34 = vmul.f32 %v2491_v16, %v830_v45  ;;  %v1113_v52 = vpop.permute.xlu1 %1112  ;;  %v1094_v16 = vsub.f32 1.0, %v1090_v4  ;;  %v2962_v58 = vld [vmem:[#allocation7_spill] sm:$0xff]  ;;  %v1234_v4 = vmul.f32 %v2964_v12, %v2959_v21 }
 0x1f0   : > { %v1141_v46 = vmul.f32 %v1137_v22, %v1097_v41  ;;  %1420 = vperm.xlu1 %1692, %v2194_v28   ;;  %v1162_v28 = vmul.f32 %v2314_v42, %v2301_v3  ;;  %v1118_v47 = vmul.f32 %v1113_v52, %v2301_v3  ;;  %v198_v42 = vld [vmem:[%s2803_s2 + $0x38] sm:$0xff]  ;;  %v1235_v32 = vsub.f32 1.0, %v1231_v56 }
 0x1f1   : > { %v858_v7 = vsub.f32 1.0, %v854_v34 }
 0x1f2   : > { %v1166_v27 = vsub.f32 1.0, %v1162_v28 }
 0x1f3   : > { %v860_v50 = vmul.f32 %v858_v7, %v856_v39  ;;  %v1125_v31 = vpop.permute.xlu1 %1124 }
 0x1f4   : > { %v1136_v57 = vadd.f32 %v1125_v31, %v1116_v10  ;;  %1694 = vset.pattern.permute.xlu1 %v2898_v44  ;;  %v1098_v44 = vmul.f32 %v1094_v16, %v2624_v17  ;;  %v206_v17 = vmax.f32 %v198_v42, 0.0  ;;  %v1238_v10 = vsub.f32 1.0, %v1234_v4 }
 0x1f5   : > { %v2684_v9 = vmul.f32 %v860_v50, %v859_v2  ;;  %1436 = vperm.xlu1 %1694, %v1943_v37   ;;  %v2963_v2 = vld [vmem:[#allocation49_spill] sm:$0xff] }
 0x1f6   : > { %v1140_v6 = vmul.f32 %v1136_v57, %v2649_v24  ;;  %v214_v54 = vmin.f32 %v206_v17, 1.0  ;;  %v1188_v34 = vmul.f32 %v2963_v2, %v2959_v21 }
 0x1f7   : > { %v1133_v40 = vpop.permute.xlu1 %1132 }
 0x1f8   : > { %v1138_v41 = vadd.f32 %v1133_v40, %v1118_v47 }
 0x1f9   : > { %1440 = vperm.xlu1 %1694, %v1902_v26  }
 0x1fa   : > { %v1142_v37 = vmul.f32 %v1138_v41, %v1098_v44  ;;  %v2965_v44 = vld [vmem:[#allocation15_spill] sm:$0xff]  ;;  %v2966_v41 = vld [vmem:[#allocation5_spill] sm:$0xff] }
 0x1fc   : > { %v1149_v24 = vpop.permute.xlu1 %1148  ;;  %v1170_v11 = vmul.f32 %v1166_v27, %v1142_v37  ;;  %v1303_v27 = vmul.f32 %v2966_v41, %v2965_v44 }
 0x1fd   : > { %v1160_v33 = vmul.f32 %v1149_v24, %v2301_v3  ;;  %1695 = vset.pattern.permute.xlu1 %v2958_v15  ;;  %v2968_v15 = vld [vmem:[#allocation27_spill] sm:$0xff] }
 0x1fe   : > { %1461 = vperm.xlu1 %1695, %v211_v60   ;;  %v2967_v60 = vld [vmem:[#allocation24_spill] sm:$0xff]  ;;  %v1307_v24 = vsub.f32 1.0, %v1303_v27 }
 0x1ff   : > { %v1164_v61 = vsub.f32 1.0, %v1160_v33 }
 0x200   : > { %v1153_v49 = vpop.permute.xlu1 %1152 }
 0x201   : > { %v1168_v26 = vmul.f32 %v1164_v61, %v1140_v6  ;;  %v1161_v43 = vmul.f32 %v1153_v49, %v2301_v3 }
 0x202   : > { %1471 = vperm.xlu1 %1695, %v213_v35  }
 0x203   : > { %v1165_v48 = vsub.f32 1.0, %v1161_v43 }
 0x205   : > { %v1169_v62 = vmul.f32 %v1165_v48, %v1141_v46  ;;  %v1173_v53 = vpop.permute.xlu1 %1172 }
 0x206   : > { %v1187_v38 = vmul.f32 %v1173_v53, %v2959_v21  ;;  %1476 = vperm.xlu1 %1695, %v214_v54  }
 0x208   : > { %v1207_v5 = vadd.f32 %v2961_v18, %v1187_v38 }
 0x209   : > { %v1181_v0 = vpop.permute.xlu1 %1180 }
 0x20a   : > { %v1211_v13 = vmul.f32 %v1207_v5, %v1167_v51  ;;  %v1189_v36 = vmul.f32 %v1181_v0, %v2959_v21 }
 0x20c   : > { %v1209_v3 = vadd.f32 %v2962_v58, %v1189_v36  ;;  %v1239_v45 = vmul.f32 %v1235_v32, %v1211_v13 }
 0x20d   : > { %v1185_v23 = vpop.permute.xlu1 %1184 }
 0x20e   : > { %v1213_v22 = vmul.f32 %v1209_v3, %v1169_v62  ;;  %v1190_v39 = vmul.f32 %v1185_v23, %v2959_v21  ;;  %v2970_v62 = vld [vmem:[#allocation18_spill] sm:$0xff] }
 0x20f   : > { %v1306_v53 = vmul.f32 %v2970_v62, %v2965_v44 }
 0x211   : > { %v1197_v52 = vpop.permute.xlu1 %1196  ;;  %v1310_v18 = vsub.f32 1.0, %v1306_v53 }
 0x212   : > { %v1208_v46 = vadd.f32 %v1197_v52, %v1188_v34 }
 0x214   : > { %v1212_v7 = vmul.f32 %v1208_v46, %v1168_v26  ;;  %v2969_v26 = vld [vmem:[#allocation25_spill] sm:$0xff] }
 0x215   : > { %v1205_v14 = vpop.permute.xlu1 %1204  ;;  %v1260_v43 = vmul.f32 %v2969_v26, %v2965_v44  ;;  %v1404_v26 = vmul.f32 %v2601_v1, %v2609_v30 }
 0x216   : > { %v1210_v51 = vadd.f32 %v1205_v14, %v1190_v39 }
 0x218   : > { %v1214_v50 = vmul.f32 %v1210_v51, %v1170_v11  ;;  %v2971_v51 = vld [vmem:[#allocation35_spill] sm:$0xff] }
 0x21a   : > { %v1221_v31 = vpop.permute.xlu1 %1220  ;;  %v1242_v19 = vmul.f32 %v1238_v10, %v1214_v50  ;;  %v1375_v10 = vmul.f32 %v2971_v51, %v2519_v63  ;;  %v2972_v50 = vld [vmem:[#allocation38_spill] sm:$0xff] }
 0x21b   : > { %v1232_v57 = vmul.f32 %v1221_v31, %v2959_v21 }
 0x21d   : > { %v1236_v16 = vsub.f32 1.0, %v1232_v57  ;;  %v1433_v57 = vpop.permute.xlu0 %1432 }
 0x21e   : > { %v1225_v28 = vpop.permute.xlu1 %1224 }
 0x21f   : > { %v1240_v47 = vmul.f32 %v1236_v16, %v1212_v7  ;;  %v1233_v6 = vmul.f32 %v1225_v28, %v2959_v21  ;;  %v2973_v16 = vld [vmem:[#allocation21_spill] sm:$0xff] }
 0x220   : > { %v1332_v28 = vmul.f32 %v2973_v16, %v2519_v63 }
 0x221   : > { %v1237_v29 = vsub.f32 1.0, %v1233_v6  ;;  %v1445_v53 = vpop.permute.xlu0 %1444 }
 0x223   : > { %v1241_v40 = vmul.f32 %v1237_v29, %v1213_v22  ;;  %v1245_v59 = vpop.permute.xlu1 %1244 }
 0x224   : > { %v1259_v37 = vmul.f32 %v1245_v59, %v2965_v44 }
 0x226   : > { %v1279_v25 = vadd.f32 %v2967_v60, %v1259_v37  ;;  %v1447_v37 = vmul.f32 %v1433_v57, %v2609_v30 }
 0x227   : > { %v1253_v42 = vpop.permute.xlu1 %1252 }
 0x228   : > { %v1283_v11 = vmul.f32 %v1279_v25, %v1239_v45  ;;  %v1261_v33 = vmul.f32 %v1253_v42, %v2965_v44  ;;  %v2974_v25 = vld [vmem:[#allocation32_spill] sm:$0xff]  ;;  %v1451_v62 = vsub.f32 1.0, %v1447_v37 }
 0x22a   : > { %v1281_v35 = vadd.f32 %v2968_v15, %v1261_v33  ;;  %v1311_v17 = vmul.f32 %v1307_v24, %v1283_v11  ;;  %v2975_v33 = vld [vmem:[#allocation26_spill] sm:$0xff] }
 0x22b   : > { %v1257_v61 = vpop.permute.xlu1 %1256  ;;  %v1378_v15 = vmul.f32 %v2975_v33, %v2519_v63 }
 0x22c   : > { %v1285_v49 = vmul.f32 %v1281_v35, %v1241_v40  ;;  %v1262_v21 = vmul.f32 %v1257_v61, %v2965_v44 }
 0x22f   : > { %v1269_v54 = vpop.permute.xlu1 %1268 }
 0x230   : > { %v1280_v48 = vadd.f32 %v1269_v54, %v1260_v43 }
 0x232   : > { %v1284_v8 = vmul.f32 %v1280_v48, %v1240_v47 }
 0x233   : > { %v1277_v56 = vpop.permute.xlu1 %1276 }
 0x234   : > { %v1282_v38 = vadd.f32 %v1277_v56, %v1262_v21 }
 0x236   : > { %v1286_v5 = vmul.f32 %v1282_v38, %v1242_v19 }
 0x238   : > { %v1293_v0 = vpop.permute.xlu1 %1292  ;;  %v1314_v32 = vmul.f32 %v1310_v18, %v1286_v5 }
 0x239   : > { %v1304_v39 = vmul.f32 %v1293_v0, %v2965_v44 }
 0x23b   : > { %v1308_v6 = vsub.f32 1.0, %v1304_v39 }
 0x23c   : > { %v1297_v13 = vpop.permute.xlu1 %1296 }
 0x23d   : > { %v1305_v7 = vmul.f32 %v1297_v13, %v2965_v44  ;;  %v1379_v44 = vsub.f32 1.0, %v1375_v10 }
 0x23f   : > { %v1309_v29 = vsub.f32 1.0, %v1305_v7 }
 0x241   : > { %v1317_v36 = vpop.permute.xlu1 %1316  ;;  %v1313_v43 = vmul.f32 %v1309_v29, %v1285_v49  ;;  %v1382_v49 = vsub.f32 1.0, %v1378_v15 }
 0x242   : > { %v1331_v4 = vmul.f32 %v1317_v36, %v2519_v63 }
 0x244   : > { %v1351_v31 = vadd.f32 %v2972_v50, %v1331_v4 }
 0x245   : > { %v1325_v58 = vpop.permute.xlu1 %1324 }
 0x246   : > { %v1333_v19 = vmul.f32 %v1325_v58, %v2519_v63  ;;  %v1355_v41 = vmul.f32 %v1351_v31, %v1311_v17  ;;  %v1312_v17 = vmul.f32 %v1308_v6, %v1284_v8  ;;  %v1450_v58 = vmul.f32 %v1445_v53, %v2609_v30 }
 0x247   : > { %v863_v31 = vrot.slane %v2684_v9, 4 }
 0x248   : > { %v1353_v42 = vadd.f32 %v2974_v25, %v1333_v19  ;;  %v1383_v38 = vmul.f32 %v1379_v44, %v1355_v41  ;;  %v1454_v39 = vsub.f32 1.0, %v1450_v58 }
 0x249   : > { %v1329_v3 = vpop.permute.xlu1 %1328  ;;  %v865_v6 = vmul.f32 %v863_v31, %v2684_v9 }
 0x24a   : > { %v1334_v40 = vmul.f32 %v1329_v3, %v2519_v63  ;;  %v1357_v18 = vmul.f32 %v1353_v42, %v1313_v43 }
 0x24b   : > { %v867_v41 = vrot.slane %v865_v6, 2 }
 0x24d   : > { %v1341_v45 = vpop.permute.xlu1 %1340 }
 0x24e   : > { %v1352_v24 = vadd.f32 %v1341_v45, %v1332_v28 }
 0x250   : > { %v1356_v5 = vmul.f32 %v1352_v24, %v1312_v17 }
 0x251   : > { %v1349_v23 = vpop.permute.xlu1 %1348 }
 0x252   : > { %v1354_v11 = vadd.f32 %v1349_v23, %v1334_v40 }
 0x256   : > { %v1365_v22 = vpop.permute.xlu1 %1364 }
 0x257   : > { %v1376_v59 = vmul.f32 %v1365_v22, %v2519_v63 }
 0x259   : > { %v1380_v54 = vsub.f32 1.0, %v1376_v59 }
 0x25a   : > { %v1369_v2 = vpop.permute.xlu1 %1368 }
 0x25b   : > { %v1377_v27 = vmul.f32 %v1369_v2, %v2519_v63  ;;  %v1358_v63 = vmul.f32 %v1354_v11, %v1314_v32  ;;  %v1384_v36 = vmul.f32 %v1380_v54, %v1356_v5 }
 0x25d   : > { %v1381_v48 = vsub.f32 1.0, %v1377_v27 }
 0x25f   : > { %v1389_v34 = vpop.permute.xlu1 %1388  ;;  %v1385_v3 = vmul.f32 %v1381_v48, %v1357_v18 }
 0x260   : > { %v1403_v47 = vmul.f32 %v1389_v34, %v2609_v30 }
 0x262   : > { %v1423_v35 = vadd.f32 %v2617_v55, %v1403_v47 }
 0x263   : > { %v1397_v52 = vpop.permute.xlu1 %1396 }
 0x264   : > { %v1405_v61 = vmul.f32 %v1397_v52, %v2609_v30  ;;  %v1427_v8 = vmul.f32 %v1423_v35, %v1383_v38  ;;  %v1386_v52 = vmul.f32 %v1382_v49, %v1358_v63 }
 0x266   : > { %v1425_v0 = vadd.f32 %v2637_v20, %v1405_v61  ;;  %v1455_v32 = vmul.f32 %v1451_v62, %v1427_v8 }
 0x267   : > { %v1401_v46 = vpop.permute.xlu1 %1400 }
 0x268   : > { %v1406_v13 = vmul.f32 %v1401_v46, %v2609_v30  ;;  %v1429_v4 = vmul.f32 %v1425_v0, %v1385_v3 }
 0x26b   : > { %v1413_v12 = vpop.permute.xlu1 %1412 }
 0x26c   : > { %v1424_v1 = vadd.f32 %v1413_v12, %v1404_v26  ;;  %v1467_v12 = vpop.permute.xlu0 %1466 }
 0x26e   : > { %v1428_v34 = vmul.f32 %v1424_v1, %v1384_v36 }
 0x26f   : > { %v1421_v14 = vpop.permute.xlu1 %1420 }
 0x270   : > { %v1426_v45 = vadd.f32 %v1421_v14, %v1406_v13 }
 0x272   : > { %v1430_v7 = vmul.f32 %v1426_v45, %v1386_v52 }
 0x274   : > { %v1437_v60 = vpop.permute.xlu1 %1436  ;;  %v1458_v57 = vmul.f32 %v1454_v39, %v1430_v7 }
 0x275   : > { %v1448_v21 = vmul.f32 %v1437_v60, %v2609_v30  ;;  %v869_v60 = vmul.f32 %v867_v41, %v865_v6 }
 0x277   : > { %v1452_v23 = vsub.f32 1.0, %v1448_v21  ;;  %v871_v24 = vrot.slane %v869_v60, 1 }
 0x278   : > { %v1441_v56 = vpop.permute.xlu1 %1440 }
 0x279   : > { %v1449_v55 = vmul.f32 %v1441_v56, %v2609_v30  ;;  %v1456_v20 = vmul.f32 %v1452_v23, %v1428_v34  ;;  %v873_v33 = vmul.f32 %v871_v24, %v869_v60 }
 0x27b   : > { %v1453_v22 = vsub.f32 1.0, %v1449_v55  ;;  %v1480_v30 = vmul.f32 %v1467_v12, %v1456_v20  ;;  %v874_v9 = vsub.f32 1.0, %v873_v33 }
 0x27d   : > { %v1462_v2 = vpop.permute.xlu1 %1461  ;;  %v1457_v46 = vmul.f32 %v1453_v22, %v1429_v4  ;;  %v1484_v29 = vsub.f32 1.0, %v1480_v30 }
 0x27e   : > { %v1479_v51 = vmul.f32 %v1462_v2, %v1455_v32 }
 0x280   : > { %v1483_v14 = vsub.f32 1.0, %v1479_v51 }
 0x281   : > { %v1472_v10 = vpop.permute.xlu1 %1471 }
 0x282   : > { %v1481_v50 = vmul.f32 %v1472_v10, %v1457_v46 }
 0x284   : > { %v1485_v19 = vsub.f32 1.0, %v1481_v50 }
 0x285   : > { %v1477_v16 = vpop.permute.xlu1 %1476 }
 0x286   : > { %v1487_v28 = vmul.f32 %v1485_v19, %v1483_v14  ;;  %v1482_v47 = vmul.f32 %v1477_v16, %v1458_v57 }
 0x288   : > { %v1486_v40 = vsub.f32 1.0, %v1482_v47 }
 0x28a   : > { %v1488_v59 = vmul.f32 %v1486_v40, %v1484_v29 }
 0x28c   : > { %v1489_v44 = vmul.f32 %v1488_v59, %v1487_v28 }
 0x28e   : > { %v1491_v27 = vrot.slane %v1489_v44, 4 }
 0x290   : > { %v1493_v37 = vmul.f32 %v1491_v27, %v1489_v44 }
 0x292   : > { %v1495_v25 = vrot.slane %v1493_v37, 2 }
 0x294   : > { %v1497_v42 = vmul.f32 %v1495_v25, %v1493_v37 }
 0x296   : > { %v1499_v11 = vrot.slane %v1497_v42, 1 }
 0x298   : > { %v1501_v15 = vmul.f32 %v1499_v11, %v1497_v42 }
 0x29a   : > { %v1502_v35 = vsub.f32 1.0, %v1501_v15 }
 0x29c   : > { %v1504_v61 = vrot.slane %v1502_v35, 7 }
 0x29e   : > { %v1507_v26 = vsel %vm1506_vm0, %v874_v9, %v1504_v61 }
 0x29f   : > { %1508 = vst [vmem:[%s161_s28] sm:$0x3] %v1507_v26 }
 0x2a0   : > { %1710 = shalt.err (!%p1707_p3)
}
 0x2a1   : > { %s1711_s10 = scalar_lea.hbm %s2759_s5, 32  ;;  %s1715_s19 = scalar_lea.hbm %s2804_s3, 64 }
 0x2a2   : > { %p1712_p4 = scmp.ne.s32.totalorder %s2759_s5, %s1711_s10  ;;  %p1716_p9 = scmp.lt.u32.totalorder %s2759_s5, %s2804_s3 }
 0x2a3   : > { %p1717_p10 = scmp.lt.u32.totalorder %s1715_s19, %s1711_s10  ;;  %p1719_p12 = scmp.lt.u32.totalorder %s1711_s10, %s2759_s5 }
 0x2a4   : > { %p1713_p7 = pnand %p1712_p4, %p1836_p5 }
 0x2a5   : > { %p1718_p11 = por %p1717_p10, %p1716_p9 }
 0x2a6   : > { %p1714_p8 = pneg %p1713_p7 }
 0x2a7   : > { %p1720_p13 = por %p1719_p12, %p1718_p11 }
 0x2a9   : > { %p1721_p0 = pnand %p1720_p13, %p1714_p8 }
 0x2ab   : > { %1724 = shalt.err (!%p1721_p0)
}
 0x2ac   : > { %1592 = dma.vmem_to_hbm [thread:$0]  (%p1836_p5), %s2761_s29, 32, %s2759_s5, %s1510_s6  }
 0x2ad PF: > { %p1598_p1 = scmp.ge.s32.totalorder %s1759_s15, 2  ;;  %s1535_s25 = sand.u32 1, %s1747_s12  }
 0x2ae   : > { %s1536_s26 = scalar_lea.sflag [#allocation3], %s1535_s25 }
 0x2af   : > { %p1595_p2 = pnand %p1598_p1, %p1840_p6 }
 0x2b1   : > { %1742 = dma.done.wait (!%p1595_p2), %s1536_s26, 32  }
 0x2b2   : > { %1744 = vsyncadd (!%p1595_p2), %s1536_s26, 4294967264  ;;  %p13_p3 = scmp.ge.s32.totalorder %s1823_s18, 4   ;;  %s2976_s12 = smov %s1751_s13 }
 0x2b3   : > { %s2977_s13 = smov %s1755_s14  ;;  %s2978_s14 = smov %s1834_s21 }
 0x2b4   : > { %s2979_s15 = smov %s1823_s18  ;;  %15 = sbr.rel (!%p13_p3) target bundleno = 3 (0x3), region = 67 }
 0x2bb   :  { %1541 = vsyncpa [#allocation3], 1 }
 0x2bc   :  { %1543 = vsyncpa [#allocation3 + $0x1], 1 }

</bundles_post_ra>
